<compile_context>
chip_gen: v7x
topology: tpu7x:2x2x1
jax: 0.10.0
libtpu: 0.0.40
codegen_flags: <defaults>
</compile_context>

<pallas_src>
import functools
import math

import jax
import jax.numpy as jnp
from jax import lax
from jax.experimental import pallas as pl
from jax.experimental.pallas import tpu as pltpu

LN_EPS = 1e-5


# ------------------------------ fused kernel ------------------------------

def _layer_norm(x, g, b):
    mu = jnp.mean(x, axis=-1, keepdims=True)
    var = jnp.mean(jnp.square(x - mu), axis=-1, keepdims=True)
    return (x - mu) * lax.rsqrt(var + LN_EPS) * g + b


def _fused_agent_kernel(
    # fetched once (constant block index)
    inp_ref, pe_ref, emb_w_ref, mask_ref,
    # per-layer slabs (pipelined over the layer grid axis)
    wqkv_ref, wo_ref, wff1_ref, wff2_ref, lbias_ref,
    # head weights (fetched once)
    belief_w_ref, param_w_ref, out1_w_ref, out2_w_ref, gbias_ref,
    # packed output: action | belief | [temperature, top_p]
    out_ref,
    # scratch: resident activations across layer steps
    x_scr,
    *, n_heads):
    l = pl.program_id(0)
    n_layers = pl.num_programs(0)
    BS, H = x_scr.shape
    dh = H // n_heads
    scale = 1.0 / math.sqrt(dh)

    # ---- first step: input embedding + (PE + embed bias), fused ----
    @pl.when(l == 0)
    def _():
        x_scr[...] = (jnp.dot(inp_ref[...], emb_w_ref[...],
                              preferred_element_type=jnp.float32)
                      + pe_ref[...])

    x = x_scr[...]                                   # [BS, H]
    lb = lbias_ref[0]                                # [8, BW] bias/LN slab
    qkvp = wqkv_ref.shape[-1]
    ffw = wff1_ref.shape[-1]

    # ---- fused QKV projection: one lane-dense MXU pass + one bias add ----
    qkv = (jnp.dot(x, wqkv_ref[0], preferred_element_type=jnp.float32)
           + lb[0:1, 0:qkvp])                        # [BS, Q|K|V|pad]
    wo = wo_ref[0]                                   # [H, H]
    neg = mask_ref[...]                              # block-diag batch mask

    # multi-head attention over all sequences at once; Wo folded per head.
    attn = jnp.zeros((BS, H), jnp.float32)
    for h in range(n_heads):                         # static unroll
        c0 = h * dh
        q_h = qkv[:, c0:c0 + dh]
        k_h = qkv[:, H + c0:H + c0 + dh]
        v_h = qkv[:, 2 * H + c0:2 * H + c0 + dh]
        s = jnp.dot(q_h, k_h.T, preferred_element_type=jnp.float32) * scale
        s = s + neg
        m = jnp.max(s, axis=-1, keepdims=True)
        p = jnp.exp(s - m)
        p = p * pl.reciprocal(jnp.sum(p, axis=-1, keepdims=True), approx=True)
        o_h = jnp.dot(p, v_h, preferred_element_type=jnp.float32)   # [BS, dh]
        attn = attn + jnp.dot(o_h, wo[c0:c0 + dh, :],
                              preferred_element_type=jnp.float32)
    attn = attn + lb[1:2, 0:H]                       # bo

    x = _layer_norm(x + attn, lb[2:3, 0:H], lb[3:4, 0:H])
    hfc = jnp.maximum(
        jnp.dot(x, wff1_ref[0], preferred_element_type=jnp.float32)
        + lb[4:5, 0:ffw], 0.0)
    ff = (jnp.dot(hfc, wff2_ref[0], preferred_element_type=jnp.float32)
          + lb[5:6, 0:H])
    x = _layer_norm(x + ff, lb[6:7, 0:H], lb[7:8, 0:H])
    x_scr[...] = x

    # ---- last step: belief / param / output heads, packed writeback ----
    @pl.when(l == n_layers - 1)
    def _():
        gb = gbias_ref[...]                          # [8, GW]
        Bd = belief_w_ref.shape[-1]
        A = out2_w_ref.shape[-1]

        belief = (jnp.dot(x, belief_w_ref[...],
                          preferred_element_type=jnp.float32) + gb[0:1, 0:Bd])

        raw = (jnp.dot(belief, param_w_ref[...],
                       preferred_element_type=jnp.float32) + gb[1:2, 0:2])
        sig = 1.0 / (1.0 + jnp.exp(-raw))            # exact sigmoid
        col = lax.broadcasted_iota(jnp.int32, raw.shape, 1)
        mult = jnp.where(col == 0, 0.9, 0.8)         # col 0: temperature
        hi = jnp.where(col == 0, 1.0, 0.9)           # col 1: top_p
        scl = jnp.clip(sig * mult + 0.1, 0.1, hi)

        h1 = (jnp.dot(belief, out1_w_ref[...],
                      preferred_element_type=jnp.float32) + gb[2:3, 0:H])
        h1 = jnp.maximum(_layer_norm(h1, gb[3:4, 0:H], gb[4:5, 0:H]), 0.0)
        act = (jnp.dot(h1, out2_w_ref[...],
                       preferred_element_type=jnp.float32) + gb[5:6, 0:A])

        out_ref[:, 0:A] = act
        out_ref[:, A:A + Bd] = belief
        out_ref[:, A + Bd:A + Bd + 2] = scl


# ----------------------------- model plumbing -----------------------------

def sinusoidal_pe(seq_len, dim):
    pos = jnp.arange(seq_len, dtype=jnp.float32)[:, None]
    i = jnp.arange(0, dim, 2, dtype=jnp.float32)
    div = jnp.exp(-math.log(10000.0) * i / dim)
    pe = jnp.zeros((seq_len, dim), jnp.float32)
    pe = pe.at[:, 0::2].set(jnp.sin(pos * div))
    pe = pe.at[:, 1::2].set(jnp.cos(pos * div))
    return pe  # [S, dim]


def init_params(key, input_dim, hidden_dim, belief_dim, n_heads, n_layers,
                n_actions):
    keys = iter(jax.random.split(key, 32))

    def w(shape, scale=0.05):
        return (scale * jax.random.normal(next(keys), shape)).astype(jnp.float32)

    H, L, F, Bd = hidden_dim, n_layers, 4 * hidden_dim, belief_dim
    return dict(
        emb_w=w((input_dim, H)), emb_b=w((1, H)),
        wq=w((L, H, H)), bq=w((L, 1, H)),
        wk=w((L, H, H)), bk=w((L, 1, H)),
        wv=w((L, H, H)), bv=w((L, 1, H)),
        wo=w((L, H, H)), bo=w((L, 1, H)),
        ln1_g=jnp.ones((L, 1, H), jnp.float32),
        ln1_b=jnp.zeros((L, 1, H), jnp.float32),
        ff1_w=w((L, H, F)), ff1_b=w((L, 1, F)),
        ff2_w=w((L, F, H)), ff2_b=w((L, 1, H)),
        ln2_g=jnp.ones((L, 1, H), jnp.float32),
        ln2_b=jnp.zeros((L, 1, H), jnp.float32),
        # TODO(synk): belief_net / param_net are referenced but never defined
        # in the reference __init__; modeled here as single Linear layers.
        belief_w=w((H, Bd)), belief_b=w((1, Bd)),
        param_w=w((Bd, 2)), param_b=w((1, 2)),
        out1_w=w((Bd, H)), out1_b=w((1, H)),
        out_ln_g=jnp.ones((1, H), jnp.float32),
        out_ln_b=jnp.zeros((1, H), jnp.float32),
        out2_w=w((H, n_actions)), out2_b=w((1, n_actions)),
    )


def llm_transformer_agent_forward(params, inputs, n_heads):
    """inputs: [S, B, input_dim] (seq-first, torch MultiheadAttention default)."""
    S, B, Din = inputs.shape
    H = params['emb_w'].shape[1]
    Bd = params['belief_w'].shape[1]
    A = params['out2_w'].shape[1]
    L = params['wq'].shape[0]
    F = params['ff1_w'].shape[-1]
    BS = B * S
    assert H % n_heads == 0

    # ---------- wrapper-side packing (tiny, amortized over the kernel) ------
    # batch-major rows: row b*S + s  <->  (batch b, seq s)
    x_bm = inputs.transpose(1, 0, 2).reshape(BS, Din)
    # positional encoding with the embed bias folded in
    pe_bm = jnp.tile(sinusoidal_pe(S, H) + params['emb_b'], (B, 1))
    # block-diagonal additive mask: only same-sequence attention is allowed
    bid = jnp.repeat(jnp.arange(B), S)
    mask = jnp.where(bid[:, None] == bid[None, :], 0.0, -1e30).astype(jnp.float32)

    # fused QKV weight, output padded up to a multiple of 128 lanes
    qkvp = ((3 * H + 127) // 128) * 128
    wqkv = jnp.concatenate([params['wq'], params['wk'], params['wv']], axis=-1)
    wqkv = jnp.pad(wqkv, ((0, 0), (0, 0), (0, qkvp - 3 * H)))

    # per-layer bias / LayerNorm slab [L, 8, BW]
    BW = max(qkvp, F, H)

    def prow(a):  # [L,1,k] -> [L,1,BW]
        return jnp.pad(a, ((0, 0), (0, 0), (0, BW - a.shape[-1])))

    bqkv = jnp.concatenate([params['bq'], params['bk'], params['bv']], axis=-1)
    lbias = jnp.concatenate([
        prow(bqkv), prow(params['bo']),
        prow(params['ln1_g']), prow(params['ln1_b']),
        prow(params['ff1_b']), prow(params['ff2_b']),
        prow(params['ln2_g']), prow(params['ln2_b'])], axis=1)

    # global (head) bias slab [8, GW]
    GW = max(H, Bd, A, 2)

    def grow(a):  # [1,k] -> [1,GW]
        return jnp.pad(a, ((0, 0), (0, GW - a.shape[-1])))

    gbias = jnp.concatenate([
        grow(params['belief_b']), grow(params['param_b']), grow(params['out1_b']),
        grow(params['out_ln_g']), grow(params['out_ln_b']), grow(params['out2_b']),
        jnp.zeros((2, GW), jnp.float32)], axis=0)

    # ------------------------------ specs -----------------------------------
    def const2(shape):   # fetched once, resident across all layer steps
        return pl.BlockSpec(shape, lambda l: (0, 0))

    def layer3(shape):   # one layer's slab per grid step
        return pl.BlockSpec((1,) + shape, lambda l: (l, 0, 0))

    in_specs = [
        const2((BS, Din)),        # inputs (batch-major rows)
        const2((BS, H)),          # PE + embed bias
        const2((Din, H)),         # embed weight
        const2((BS, BS)),         # block-diagonal attention mask
        layer3((H, qkvp)),        # fused QKV weight
        layer3((H, H)),           # Wo
        layer3((H, F)),           # FF1
        layer3((F, H)),           # FF2
        layer3((8, BW)),          # per-layer bias / LN slab
        const2((H, Bd)),          # belief_net
        const2((Bd, 2)),          # param_net
        const2((Bd, H)),          # output_net linear 1
        const2((H, A)),           # output_net linear 2
        const2((8, GW)),          # global bias slab
    ]
    OUTW = A + Bd + 2
    out_specs = pl.BlockSpec((BS, OUTW), lambda l: (0, 0))
    out_shape = jax.ShapeDtypeStruct((BS, OUTW), jnp.float32)

    # VMEM scaling note: double-buffered per-layer slabs are ~12*H^2*4 B; at
    # H=32 this is ~0.2 MiB.  If H/F are scaled up, add K-tiling of FF1/FF2
    # (extra grid axis over the 4H dim) before hitting v7x's 64 MiB VMEM.
    packed = pl.pallas_call(
        functools.partial(_fused_agent_kernel, n_heads=n_heads),
        out_shape=out_shape,
        grid_spec=pltpu.PrefetchScalarGridSpec(
            num_scalar_prefetch=0,
            grid=(L,),
            in_specs=in_specs,
            out_specs=out_specs,
            scratch_shapes=[pltpu.VMEM((BS, H), jnp.float32)]),
        compiler_params=pltpu.CompilerParams(
            dimension_semantics=("arbitrary",)),
    )(x_bm, pe_bm, params['emb_w'], mask,
      wqkv, params['wo'], params['ff1_w'], params['ff2_w'], lbias,
      params['belief_w'], params['param_w'], params['out1_w'], params['out2_w'],
      gbias)

    packed = packed.reshape(B, S, OUTW).transpose(1, 0, 2)   # [S, B, OUTW]
    return {
        'action_out': packed[..., 0:A],
        'belief_state': packed[..., A:A + Bd],
        'temperature': packed[..., A + Bd:A + Bd + 1],
        'top_p': packed[..., A + Bd + 1:A + Bd + 2],
    }
    # TODO(synk): generate_answer / ImprovedLLMWrapper is string/API glue with
    # no tensor compute; not representable as a kernel.


# ------------------------- pure-JAX reference ------------------------------

def reference_forward(p, inputs, n_heads):
    hp = lax.Precision.HIGHEST
    S, B, _ = inputs.shape
    H = p['emb_w'].shape[1]
    dh = H // n_heads

    def ln(t, g, b):
        mu = jnp.mean(t, axis=-1, keepdims=True)
        var = jnp.mean(jnp.square(t - mu), axis=-1, keepdims=True)
        return (t - mu) * lax.rsqrt(var + LN_EPS) * g + b

    x = jnp.einsum('sbi,ih->sbh', inputs, p['emb_w'], precision=hp) + p['emb_b']
    x = x + sinusoidal_pe(S, H)[:, None, :]
    for l in range(p['wq'].shape[0]):
        q = jnp.einsum('sbh,hk->sbk', x, p['wq'][l], precision=hp) + p['bq'][l, 0]
        k = jnp.einsum('sbh,hk->sbk', x, p['wk'][l], precision=hp) + p['bk'][l, 0]
        v = jnp.einsum('sbh,hk->sbk', x, p['wv'][l], precision=hp) + p['bv'][l, 0]
        qh = q.reshape(S, B, n_heads, dh)
        kh = k.reshape(S, B, n_heads, dh)
        vh = v.reshape(S, B, n_heads, dh)
        s = jnp.einsum('sbnd,tbnd->bnst', qh, kh, precision=hp) / math.sqrt(dh)
        a = jax.nn.softmax(s, axis=-1)
        o = jnp.einsum('bnst,tbnd->sbnd', a, vh, precision=hp).reshape(S, B, H)
        attn = jnp.einsum('sbh,hk->sbk', o, p['wo'][l], precision=hp) + p['bo'][l, 0]
        x = ln(x + attn, p['ln1_g'][l, 0], p['ln1_b'][l, 0])
        hfc = jax.nn.relu(jnp.einsum('sbh,hf->sbf', x, p['ff1_w'][l],
                                     precision=hp) + p['ff1_b'][l, 0])
        ff = jnp.einsum('sbf,fh->sbh', hfc, p['ff2_w'][l],
                        precision=hp) + p['ff2_b'][l, 0]
        x = ln(x + ff, p['ln2_g'][l, 0], p['ln2_b'][l, 0])

    belief = jnp.einsum('sbh,hd->sbd', x, p['belief_w'], precision=hp) + p['belief_b']
    raw = jnp.einsum('sbd,dp->sbp', belief, p['param_w'], precision=hp) + p['param_b']
    sig = jax.nn.sigmoid(raw)
    temperature = jnp.clip(sig[..., 0:1] * 0.9 + 0.1, 0.1, 1.0)
    top_p = jnp.clip(sig[..., 1:2] * 0.8 + 0.1, 0.1, 0.9)
    h1 = jnp.einsum('sbd,dh->sbh', belief, p['out1_w'], precision=hp) + p['out1_b']
    h1 = jax.nn.relu(ln(h1, p['out_ln_g'], p['out_ln_b']))
    act = jnp.einsum('sbh,ha->sba', h1, p['out2_w'], precision=hp) + p['out2_b']
    return dict(action_out=act, belief_state=belief,
                temperature=temperature, top_p=top_p)


if __name__ == "__main__":
    S, B = 8, 2
    input_dim, hidden_dim, belief_dim = 16, 32, 16
    n_heads, n_layers, n_actions = 4, 3, 8

    key = jax.random.PRNGKey(0)
    pkey, xkey = jax.random.split(key)
    params = init_params(pkey, input_dim, hidden_dim, belief_dim,
                         n_heads, n_layers, n_actions)
    inputs = jax.random.normal(xkey, (S, B, input_dim), dtype=jnp.float32)

    fwd = jax.jit(functools.partial(llm_transformer_agent_forward,
                                    n_heads=n_heads))
    out = fwd(params, inputs)
    out = jax.tree_util.tree_map(jax.block_until_ready, out)

    assert out['action_out'].shape == (S, B, n_actions)
    assert out['belief_state'].shape == (S, B, belief_dim)
    assert out['temperature'].shape == (S, B, 1)
    assert out['top_p'].shape == (S, B, 1)
    assert bool(jnp.all(out['temperature'] >= 0.1 - 1e-6))
    assert bool(jnp.all(out['temperature'] <= 1.0 + 1e-6))
    assert bool(jnp.all(out['top_p'] >= 0.1 - 1e-6))
    assert bool(jnp.all(out['top_p'] <= 0.9 + 1e-6))

    ref = reference_forward(params, inputs, n_heads)
    for name in ('action_out', 'belief_state', 'temperature', 'top_p'):
        err = float(jnp.max(jnp.abs(out[name] - ref[name])))
        assert err < 2e-2, (name, err)

    print("KERNEL_OK")
</pallas_src>

<mosaic_0001>
module attributes {stable_mosaic.version = 11 : i64} {
  func.func @_fused_agent_kernel(%arg0: i32, %arg1: memref<16x16xf32, #tpu.memory_space<vmem>>, %arg2: memref<16x32xf32, #tpu.memory_space<vmem>>, %arg3: memref<16x32xf32, #tpu.memory_space<vmem>>, %arg4: memref<16x16xf32, #tpu.memory_space<vmem>>, %arg5: memref<1x32x128xf32, #tpu.memory_space<vmem>>, %arg6: memref<1x32x32xf32, #tpu.memory_space<vmem>>, %arg7: memref<1x32x128xf32, #tpu.memory_space<vmem>>, %arg8: memref<1x128x32xf32, #tpu.memory_space<vmem>>, %arg9: memref<1x8x128xf32, #tpu.memory_space<vmem>>, %arg10: memref<32x16xf32, #tpu.memory_space<vmem>>, %arg11: memref<16x2xf32, #tpu.memory_space<vmem>>, %arg12: memref<16x32xf32, #tpu.memory_space<vmem>>, %arg13: memref<32x8xf32, #tpu.memory_space<vmem>>, %arg14: memref<8x32xf32, #tpu.memory_space<vmem>>, %arg15: memref<16x26xf32, #tpu.memory_space<vmem>>, %arg16: memref<16x32xf32, #tpu.memory_space<vmem>>) attributes {dimension_semantics = [#tpu.dimension_semantics<arbitrary>], iteration_bounds = array<i64: 3>, scalar_prefetch = 0 : i64, scratch_operands = 1 : i64, tpu.core_type = #tpu.core_type<tc>, window_params = [{pipeline_mode = #tpu.pipeline_mode<synchronous>, transform_indices = @transform_0, window_bounds = array<i64: 16, 16>}, {pipeline_mode = #tpu.pipeline_mode<synchronous>, transform_indices = @transform_1, window_bounds = array<i64: 16, 32>}, {pipeline_mode = #tpu.pipeline_mode<synchronous>, transform_indices = @transform_2, window_bounds = array<i64: 16, 32>}, {pipeline_mode = #tpu.pipeline_mode<synchronous>, transform_indices = @transform_3, window_bounds = array<i64: 16, 16>}, {transform_indices = @transform_4, window_bounds = array<i64: 1, 32, 128>}, {transform_indices = @transform_5, window_bounds = array<i64: 1, 32, 32>}, {transform_indices = @transform_6, window_bounds = array<i64: 1, 32, 128>}, {transform_indices = @transform_7, window_bounds = array<i64: 1, 128, 32>}, {transform_indices = @transform_8, window_bounds = array<i64: 1, 8, 128>}, {pipeline_mode = #tpu.pipeline_mode<synchronous>, transform_indices = @transform_9, window_bounds = array<i64: 32, 16>}, {pipeline_mode = #tpu.pipeline_mode<synchronous>, transform_indices = @transform_10, window_bounds = array<i64: 16, 2>}, {pipeline_mode = #tpu.pipeline_mode<synchronous>, transform_indices = @transform_11, window_bounds = array<i64: 16, 32>}, {pipeline_mode = #tpu.pipeline_mode<synchronous>, transform_indices = @transform_12, window_bounds = array<i64: 32, 8>}, {pipeline_mode = #tpu.pipeline_mode<synchronous>, transform_indices = @transform_13, window_bounds = array<i64: 8, 32>}, {pipeline_mode = #tpu.pipeline_mode<synchronous>, transform_indices = @transform_14, window_bounds = array<i64: 16, 26>}]} {
    %c0_i32 = arith.constant 0 : i32
    %0 = arith.cmpi eq, %arg0, %c0_i32 : i32
    %1 = arith.extui %0 : i1 to i32
    %c0_i32_0 = arith.constant 0 : i32
    %2 = arith.cmpi ne, %1, %c0_i32_0 : i32
    scf.if %2 {
      %c0_60 = arith.constant 0 : index
      %c0_61 = arith.constant 0 : index
      %175 = vector.load %arg1[%c0_60, %c0_61] : memref<16x16xf32, #tpu.memory_space<vmem>>, vector<16x16xf32>
      %c0_62 = arith.constant 0 : index
      %c0_63 = arith.constant 0 : index
      %176 = vector.load %arg3[%c0_62, %c0_63] : memref<16x32xf32, #tpu.memory_space<vmem>>, vector<16x32xf32>
      %cst_64 = arith.constant dense<0.000000e+00> : vector<16x32xf32>
      %177 = tpu.matmul %175, %176, %cst_64 {dimension_numbers = #tpu.dot_dimension_numbers<[1], [0], [0], [1], [0, 0, 1, 1], [], []>} : vector<16x16xf32>, vector<16x32xf32>, vector<16x32xf32> -> vector<16x32xf32>
      %c0_65 = arith.constant 0 : index
      %c0_66 = arith.constant 0 : index
      %178 = vector.load %arg2[%c0_65, %c0_66] : memref<16x32xf32, #tpu.memory_space<vmem>>, vector<16x32xf32>
      %179 = arith.addf %177, %178 : vector<16x32xf32>
      %c0_67 = arith.constant 0 : index
      %c0_68 = arith.constant 0 : index
      %180 = vector.load %arg16[%c0_67, %c0_68] : memref<16x32xf32, #tpu.memory_space<vmem>>, vector<16x32xf32>
      tpu.vector_store %arg16[%c0_67, %c0_68], %179 {strides = array<i32>} : memref<16x32xf32, #tpu.memory_space<vmem>>, vector<16x32xf32>,
    } else {
    }
    %c0 = arith.constant 0 : index
    %c0_1 = arith.constant 0 : index
    %3 = vector.load %arg16[%c0, %c0_1] : memref<16x32xf32, #tpu.memory_space<vmem>>, vector<16x32xf32>
    %c0_2 = arith.constant 0 : index
    %c0_3 = arith.constant 0 : index
    %c0_4 = arith.constant 0 : index
    %4 = vector.load %arg9[%c0_2, %c0_3, %c0_4] : memref<1x8x128xf32, #tpu.memory_space<vmem>>, vector<1x8x128xf32>
    %5 = vector.shape_cast %4 : vector<1x8x128xf32> to vector<8x128xf32>
    %c0_5 = arith.constant 0 : index
    %c0_6 = arith.constant 0 : index
    %c0_7 = arith.constant 0 : index
    %6 = vector.load %arg5[%c0_5, %c0_6, %c0_7] : memref<1x32x128xf32, #tpu.memory_space<vmem>>, vector<1x32x128xf32>
    %7 = vector.shape_cast %6 : vector<1x32x128xf32> to vector<32x128xf32>
    %cst = arith.constant dense<0.000000e+00> : vector<16x128xf32>
    %8 = tpu.matmul %3, %7, %cst {dimension_numbers = #tpu.dot_dimension_numbers<[1], [0], [0], [1], [0, 0, 1, 1], [], []>} : vector<16x32xf32>, vector<32x128xf32>, vector<16x128xf32> -> vector<16x128xf32>
    %9 = vector.extract_strided_slice %5 {offsets = [0, 0], sizes = [1, 128], strides = [1, 1]} : vector<8x128xf32> to vector<1x128xf32>
    %10 = vector.broadcast %9 : vector<1x128xf32> to vector<16x128xf32>
    %11 = arith.addf %8, %10 : vector<16x128xf32>
    %c0_8 = arith.constant 0 : index
    %c0_9 = arith.constant 0 : index
    %c0_10 = arith.constant 0 : index
    %12 = vector.load %arg6[%c0_8, %c0_9, %c0_10] : memref<1x32x32xf32, #tpu.memory_space<vmem>>, vector<1x32x32xf32>
    %13 = vector.shape_cast %12 : vector<1x32x32xf32> to vector<32x32xf32>
    %c0_11 = arith.constant 0 : index
    %c0_12 = arith.constant 0 : index
    %14 = vector.load %arg4[%c0_11, %c0_12] : memref<16x16xf32, #tpu.memory_space<vmem>>, vector<16x16xf32>
    %cst_13 = arith.constant 0.000000e+00 : f32
    %15 = vector.broadcast %cst_13 : f32 to vector<16x32xf32>
    %16 = vector.extract_strided_slice %11 {offsets = [0, 0], sizes = [16, 8], strides = [1, 1]} : vector<16x128xf32> to vector<16x8xf32>
    %17 = vector.extract_strided_slice %11 {offsets = [0, 32], sizes = [16, 8], strides = [1, 1]} : vector<16x128xf32> to vector<16x8xf32>
    %18 = vector.extract_strided_slice %11 {offsets = [0, 64], sizes = [16, 8], strides = [1, 1]} : vector<16x128xf32> to vector<16x8xf32>
    %19 = tpu.transpose %17, [1, 0] : vector<16x8xf32> -> vector<8x16xf32>
    %cst_14 = arith.constant dense<0.000000e+00> : vector<16x16xf32>
    %20 = tpu.matmul %16, %19, %cst_14 {dimension_numbers = #tpu.dot_dimension_numbers<[1], [0], [0], [1], [0, 0, 1, 1], [], []>} : vector<16x8xf32>, vector<8x16xf32>, vector<16x16xf32> -> vector<16x16xf32>
    %cst_15 = arith.constant 0.353553385 : f32
    %21 = vector.broadcast %cst_15 : f32 to vector<16x16xf32>
    %22 = arith.mulf %20, %21 : vector<16x16xf32>
    %23 = arith.addf %22, %14 : vector<16x16xf32>
    %cst_16 = arith.constant dense<0xFF800000> : vector<16xf32>
    %24 = vector.multi_reduction <maximumf>, %23, %cst_16 [1] : vector<16x16xf32> to vector<16xf32>
    %25 = vector.shape_cast %24 : vector<16xf32> to vector<16x1xf32>
    %26 = vector.broadcast %25 : vector<16x1xf32> to vector<16x16xf32>
    %27 = arith.subf %23, %26 : vector<16x16xf32>
    %28 = math.exp %27 : vector<16x16xf32>
    %cst_17 = arith.constant dense<0.000000e+00> : vector<16xf32>
    %29 = vector.multi_reduction <add>, %28, %cst_17 [1] : vector<16x16xf32> to vector<16xf32>
    %30 = vector.shape_cast %29 : vector<16xf32> to vector<16x1xf32>
    %31 = tpu.reciprocal %30 {approx = true} : vector<16x1xf32> -> vector<16x1xf32>
    %32 = vector.broadcast %31 : vector<16x1xf32> to vector<16x16xf32>
    %33 = arith.mulf %28, %32 : vector<16x16xf32>
    %cst_18 = arith.constant dense<0.000000e+00> : vector<16x8xf32>
    %34 = tpu.matmul %33, %18, %cst_18 {dimension_numbers = #tpu.dot_dimension_numbers<[1], [0], [0], [1], [0, 0, 1, 1], [], []>} : vector<16x16xf32>, vector<16x8xf32>, vector<16x8xf32> -> vector<16x8xf32>
    %35 = vector.extract_strided_slice %13 {offsets = [0, 0], sizes = [8, 32], strides = [1, 1]} : vector<32x32xf32> to vector<8x32xf32>
    %cst_19 = arith.constant dense<0.000000e+00> : vector<16x32xf32>
    %36 = tpu.matmul %34, %35, %cst_19 {dimension_numbers = #tpu.dot_dimension_numbers<[1], [0], [0], [1], [0, 0, 1, 1], [], []>} : vector<16x8xf32>, vector<8x32xf32>, vector<16x32xf32> -> vector<16x32xf32>
    %37 = arith.addf %15, %36 : vector<16x32xf32>
    %38 = vector.extract_strided_slice %11 {offsets = [0, 8], sizes = [16, 8], strides = [1, 1]} : vector<16x128xf32> to vector<16x8xf32>
    %39 = vector.extract_strided_slice %11 {offsets = [0, 40], sizes = [16, 8], strides = [1, 1]} : vector<16x128xf32> to vector<16x8xf32>
    %40 = vector.extract_strided_slice %11 {offsets = [0, 72], sizes = [16, 8], strides = [1, 1]} : vector<16x128xf32> to vector<16x8xf32>
    %41 = tpu.transpose %39, [1, 0] : vector<16x8xf32> -> vector<8x16xf32>
    %cst_20 = arith.constant dense<0.000000e+00> : vector<16x16xf32>
    %42 = tpu.matmul %38, %41, %cst_20 {dimension_numbers = #tpu.dot_dimension_numbers<[1], [0], [0], [1], [0, 0, 1, 1], [], []>} : vector<16x8xf32>, vector<8x16xf32>, vector<16x16xf32> -> vector<16x16xf32>
    %cst_21 = arith.constant 0.353553385 : f32
    %43 = vector.broadcast %cst_21 : f32 to vector<16x16xf32>
    %44 = arith.mulf %42, %43 : vector<16x16xf32>
    %45 = arith.addf %44, %14 : vector<16x16xf32>
    %cst_22 = arith.constant dense<0xFF800000> : vector<16xf32>
    %46 = vector.multi_reduction <maximumf>, %45, %cst_22 [1] : vector<16x16xf32> to vector<16xf32>
    %47 = vector.shape_cast %46 : vector<16xf32> to vector<16x1xf32>
    %48 = vector.broadcast %47 : vector<16x1xf32> to vector<16x16xf32>
    %49 = arith.subf %45, %48 : vector<16x16xf32>
    %50 = math.exp %49 : vector<16x16xf32>
    %cst_23 = arith.constant dense<0.000000e+00> : vector<16xf32>
    %51 = vector.multi_reduction <add>, %50, %cst_23 [1] : vector<16x16xf32> to vector<16xf32>
    %52 = vector.shape_cast %51 : vector<16xf32> to vector<16x1xf32>
    %53 = tpu.reciprocal %52 {approx = true} : vector<16x1xf32> -> vector<16x1xf32>
    %54 = vector.broadcast %53 : vector<16x1xf32> to vector<16x16xf32>
    %55 = arith.mulf %50, %54 : vector<16x16xf32>
    %cst_24 = arith.constant dense<0.000000e+00> : vector<16x8xf32>
    %56 = tpu.matmul %55, %40, %cst_24 {dimension_numbers = #tpu.dot_dimension_numbers<[1], [0], [0], [1], [0, 0, 1, 1], [], []>} : vector<16x16xf32>, vector<16x8xf32>, vector<16x8xf32> -> vector<16x8xf32>
    %57 = vector.extract_strided_slice %13 {offsets = [8, 0], sizes = [8, 32], strides = [1, 1]} : vector<32x32xf32> to vector<8x32xf32>
    %cst_25 = arith.constant dense<0.000000e+00> : vector<16x32xf32>
    %58 = tpu.matmul %56, %57, %cst_25 {dimension_numbers = #tpu.dot_dimension_numbers<[1], [0], [0], [1], [0, 0, 1, 1], [], []>} : vector<16x8xf32>, vector<8x32xf32>, vector<16x32xf32> -> vector<16x32xf32>
    %59 = arith.addf %37, %58 : vector<16x32xf32>
    %60 = vector.extract_strided_slice %11 {offsets = [0, 16], sizes = [16, 8], strides = [1, 1]} : vector<16x128xf32> to vector<16x8xf32>
    %61 = vector.extract_strided_slice %11 {offsets = [0, 48], sizes = [16, 8], strides = [1, 1]} : vector<16x128xf32> to vector<16x8xf32>
    %62 = vector.extract_strided_slice %11 {offsets = [0, 80], sizes = [16, 8], strides = [1, 1]} : vector<16x128xf32> to vector<16x8xf32>
    %63 = tpu.transpose %61, [1, 0] : vector<16x8xf32> -> vector<8x16xf32>
    %cst_26 = arith.constant dense<0.000000e+00> : vector<16x16xf32>
    %64 = tpu.matmul %60, %63, %cst_26 {dimension_numbers = #tpu.dot_dimension_numbers<[1], [0], [0], [1], [0, 0, 1, 1], [], []>} : vector<16x8xf32>, vector<8x16xf32>, vector<16x16xf32> -> vector<16x16xf32>
    %cst_27 = arith.constant 0.353553385 : f32
    %65 = vector.broadcast %cst_27 : f32 to vector<16x16xf32>
    %66 = arith.mulf %64, %65 : vector<16x16xf32>
    %67 = arith.addf %66, %14 : vector<16x16xf32>
    %cst_28 = arith.constant dense<0xFF800000> : vector<16xf32>
    %68 = vector.multi_reduction <maximumf>, %67, %cst_28 [1] : vector<16x16xf32> to vector<16xf32>
    %69 = vector.shape_cast %68 : vector<16xf32> to vector<16x1xf32>
    %70 = vector.broadcast %69 : vector<16x1xf32> to vector<16x16xf32>
    %71 = arith.subf %67, %70 : vector<16x16xf32>
    %72 = math.exp %71 : vector<16x16xf32>
    %cst_29 = arith.constant dense<0.000000e+00> : vector<16xf32>
    %73 = vector.multi_reduction <add>, %72, %cst_29 [1] : vector<16x16xf32> to vector<16xf32>
    %74 = vector.shape_cast %73 : vector<16xf32> to vector<16x1xf32>
    %75 = tpu.reciprocal %74 {approx = true} : vector<16x1xf32> -> vector<16x1xf32>
    %76 = vector.broadcast %75 : vector<16x1xf32> to vector<16x16xf32>
    %77 = arith.mulf %72, %76 : vector<16x16xf32>
    %cst_30 = arith.constant dense<0.000000e+00> : vector<16x8xf32>
    %78 = tpu.matmul %77, %62, %cst_30 {dimension_numbers = #tpu.dot_dimension_numbers<[1], [0], [0], [1], [0, 0, 1, 1], [], []>} : vector<16x16xf32>, vector<16x8xf32>, vector<16x8xf32> -> vector<16x8xf32>
    %79 = vector.extract_strided_slice %13 {offsets = [16, 0], sizes = [8, 32], strides = [1, 1]} : vector<32x32xf32> to vector<8x32xf32>
    %cst_31 = arith.constant dense<0.000000e+00> : vector<16x32xf32>
    %80 = tpu.matmul %78, %79, %cst_31 {dimension_numbers = #tpu.dot_dimension_numbers<[1], [0], [0], [1], [0, 0, 1, 1], [], []>} : vector<16x8xf32>, vector<8x32xf32>, vector<16x32xf32> -> vector<16x32xf32>
    %81 = arith.addf %59, %80 : vector<16x32xf32>
    %82 = vector.extract_strided_slice %11 {offsets = [0, 24], sizes = [16, 8], strides = [1, 1]} : vector<16x128xf32> to vector<16x8xf32>
    %83 = vector.extract_strided_slice %11 {offsets = [0, 56], sizes = [16, 8], strides = [1, 1]} : vector<16x128xf32> to vector<16x8xf32>
    %84 = vector.extract_strided_slice %11 {offsets = [0, 88], sizes = [16, 8], strides = [1, 1]} : vector<16x128xf32> to vector<16x8xf32>
    %85 = tpu.transpose %83, [1, 0] : vector<16x8xf32> -> vector<8x16xf32>
    %cst_32 = arith.constant dense<0.000000e+00> : vector<16x16xf32>
    %86 = tpu.matmul %82, %85, %cst_32 {dimension_numbers = #tpu.dot_dimension_numbers<[1], [0], [0], [1], [0, 0, 1, 1], [], []>} : vector<16x8xf32>, vector<8x16xf32>, vector<16x16xf32> -> vector<16x16xf32>
    %cst_33 = arith.constant 0.353553385 : f32
    %87 = vector.broadcast %cst_33 : f32 to vector<16x16xf32>
    %88 = arith.mulf %86, %87 : vector<16x16xf32>
    %89 = arith.addf %88, %14 : vector<16x16xf32>
    %cst_34 = arith.constant dense<0xFF800000> : vector<16xf32>
    %90 = vector.multi_reduction <maximumf>, %89, %cst_34 [1] : vector<16x16xf32> to vector<16xf32>
    %91 = vector.shape_cast %90 : vector<16xf32> to vector<16x1xf32>
    %92 = vector.broadcast %91 : vector<16x1xf32> to vector<16x16xf32>
    %93 = arith.subf %89, %92 : vector<16x16xf32>
    %94 = math.exp %93 : vector<16x16xf32>
    %cst_35 = arith.constant dense<0.000000e+00> : vector<16xf32>
    %95 = vector.multi_reduction <add>, %94, %cst_35 [1] : vector<16x16xf32> to vector<16xf32>
    %96 = vector.shape_cast %95 : vector<16xf32> to vector<16x1xf32>
    %97 = tpu.reciprocal %96 {approx = true} : vector<16x1xf32> -> vector<16x1xf32>
    %98 = vector.broadcast %97 : vector<16x1xf32> to vector<16x16xf32>
    %99 = arith.mulf %94, %98 : vector<16x16xf32>
    %cst_36 = arith.constant dense<0.000000e+00> : vector<16x8xf32>
    %100 = tpu.matmul %99, %84, %cst_36 {dimension_numbers = #tpu.dot_dimension_numbers<[1], [0], [0], [1], [0, 0, 1, 1], [], []>} : vector<16x16xf32>, vector<16x8xf32>, vector<16x8xf32> -> vector<16x8xf32>
    %101 = vector.extract_strided_slice %13 {offsets = [24, 0], sizes = [8, 32], strides = [1, 1]} : vector<32x32xf32> to vector<8x32xf32>
    %cst_37 = arith.constant dense<0.000000e+00> : vector<16x32xf32>
    %102 = tpu.matmul %100, %101, %cst_37 {dimension_numbers = #tpu.dot_dimension_numbers<[1], [0], [0], [1], [0, 0, 1, 1], [], []>} : vector<16x8xf32>, vector<8x32xf32>, vector<16x32xf32> -> vector<16x32xf32>
    %103 = arith.addf %81, %102 : vector<16x32xf32>
    %104 = vector.extract_strided_slice %5 {offsets = [1, 0], sizes = [1, 32], strides = [1, 1]} : vector<8x128xf32> to vector<1x32xf32>
    %105 = vector.broadcast %104 : vector<1x32xf32> to vector<16x32xf32>
    %106 = arith.addf %103, %105 : vector<16x32xf32>
    %107 = arith.addf %3, %106 : vector<16x32xf32>
    %108 = vector.extract_strided_slice %5 {offsets = [2, 0], sizes = [1, 32], strides = [1, 1]} : vector<8x128xf32> to vector<1x32xf32>
    %109 = vector.extract_strided_slice %5 {offsets = [3, 0], sizes = [1, 32], strides = [1, 1]} : vector<8x128xf32> to vector<1x32xf32>
    %cst_38 = arith.constant dense<0.000000e+00> : vector<16xf32>
    %110 = vector.multi_reduction <add>, %107, %cst_38 [1] : vector<16x32xf32> to vector<16xf32>
    %111 = vector.shape_cast %110 : vector<16xf32> to vector<16x1xf32>
    %cst_39 = arith.constant 3.200000e+01 : f32
    %112 = vector.broadcast %cst_39 : f32 to vector<16x1xf32>
    %113 = arith.divf %111, %112 : vector<16x1xf32>
    %114 = vector.broadcast %113 : vector<16x1xf32> to vector<16x32xf32>
    %115 = arith.subf %107, %114 : vector<16x32xf32>
    %116 = arith.mulf %115, %115 : vector<16x32xf32>
    %cst_40 = arith.constant dense<0.000000e+00> : vector<16xf32>
    %117 = vector.multi_reduction <add>, %116, %cst_40 [1] : vector<16x32xf32> to vector<16xf32>
    %118 = vector.shape_cast %117 : vector<16xf32> to vector<16x1xf32>
    %cst_41 = arith.constant 3.200000e+01 : f32
    %119 = vector.broadcast %cst_41 : f32 to vector<16x1xf32>
    %120 = arith.divf %118, %119 : vector<16x1xf32>
    %121 = vector.broadcast %113 : vector<16x1xf32> to vector<16x32xf32>
    %122 = arith.subf %107, %121 : vector<16x32xf32>
    %cst_42 = arith.constant 9.99999974E-6 : f32
    %123 = vector.broadcast %cst_42 : f32 to vector<16x1xf32>
    %124 = arith.addf %120, %123 : vector<16x1xf32>
    %125 = math.rsqrt %124 : vector<16x1xf32>
    %126 = vector.broadcast %125 : vector<16x1xf32> to vector<16x32xf32>
    %127 = arith.mulf %122, %126 : vector<16x32xf32>
    %128 = vector.broadcast %108 : vector<1x32xf32> to vector<16x32xf32>
    %129 = arith.mulf %127, %128 : vector<16x32xf32>
    %130 = vector.broadcast %109 : vector<1x32xf32> to vector<16x32xf32>
    %131 = arith.addf %129, %130 : vector<16x32xf32>
    %c0_43 = arith.constant 0 : index
    %c0_44 = arith.constant 0 : index
    %c0_45 = arith.constant 0 : index
    %132 = vector.load %arg7[%c0_43, %c0_44, %c0_45] : memref<1x32x128xf32, #tpu.memory_space<vmem>>, vector<1x32x128xf32>
    %133 = vector.shape_cast %132 : vector<1x32x128xf32> to vector<32x128xf32>
    %cst_46 = arith.constant dense<0.000000e+00> : vector<16x128xf32>
    %134 = tpu.matmul %131, %133, %cst_46 {dimension_numbers = #tpu.dot_dimension_numbers<[1], [0], [0], [1], [0, 0, 1, 1], [], []>} : vector<16x32xf32>, vector<32x128xf32>, vector<16x128xf32> -> vector<16x128xf32>
    %135 = vector.extract_strided_slice %5 {offsets = [4, 0], sizes = [1, 128], strides = [1, 1]} : vector<8x128xf32> to vector<1x128xf32>
    %136 = vector.broadcast %135 : vector<1x128xf32> to vector<16x128xf32>
    %137 = arith.addf %134, %136 : vector<16x128xf32>
    %cst_47 = arith.constant 0.000000e+00 : f32
    %138 = vector.broadcast %cst_47 : f32 to vector<16x128xf32>
    %139 = arith.maximumf %137, %138 : vector<16x128xf32>
    %c0_48 = arith.constant 0 : index
    %c0_49 = arith.constant 0 : index
    %c0_50 = arith.constant 0 : index
    %140 = vector.load %arg8[%c0_48, %c0_49, %c0_50] : memref<1x128x32xf32, #tpu.memory_space<vmem>>, vector<1x128x32xf32>
    %141 = vector.shape_cast %140 : vector<1x128x32xf32> to vector<128x32xf32>
    %cst_51 = arith.constant dense<0.000000e+00> : vector<16x32xf32>
    %142 = tpu.matmul %139, %141, %cst_51 {dimension_numbers = #tpu.dot_dimension_numbers<[1], [0], [0], [1], [0, 0, 1, 1], [], []>} : vector<16x128xf32>, vector<128x32xf32>, vector<16x32xf32> -> vector<16x32xf32>
    %143 = vector.extract_strided_slice %5 {offsets = [5, 0], sizes = [1, 32], strides = [1, 1]} : vector<8x128xf32> to vector<1x32xf32>
    %144 = vector.broadcast %143 : vector<1x32xf32> to vector<16x32xf32>
    %145 = arith.addf %142, %144 : vector<16x32xf32>
    %146 = arith.addf %131, %145 : vector<16x32xf32>
    %147 = vector.extract_strided_slice %5 {offsets = [6, 0], sizes = [1, 32], strides = [1, 1]} : vector<8x128xf32> to vector<1x32xf32>
    %148 = vector.extract_strided_slice %5 {offsets = [7, 0], sizes = [1, 32], strides = [1, 1]} : vector<8x128xf32> to vector<1x32xf32>
    %cst_52 = arith.constant dense<0.000000e+00> : vector<16xf32>
    %149 = vector.multi_reduction <add>, %146, %cst_52 [1] : vector<16x32xf32> to vector<16xf32>
    %150 = vector.shape_cast %149 : vector<16xf32> to vector<16x1xf32>
    %cst_53 = arith.constant 3.200000e+01 : f32
    %151 = vector.broadcast %cst_53 : f32 to vector<16x1xf32>
    %152 = arith.divf %150, %151 : vector<16x1xf32>
    %153 = vector.broadcast %152 : vector<16x1xf32> to vector<16x32xf32>
    %154 = arith.subf %146, %153 : vector<16x32xf32>
    %155 = arith.mulf %154, %154 : vector<16x32xf32>
    %cst_54 = arith.constant dense<0.000000e+00> : vector<16xf32>
    %156 = vector.multi_reduction <add>, %155, %cst_54 [1] : vector<16x32xf32> to vector<16xf32>
    %157 = vector.shape_cast %156 : vector<16xf32> to vector<16x1xf32>
    %cst_55 = arith.constant 3.200000e+01 : f32
    %158 = vector.broadcast %cst_55 : f32 to vector<16x1xf32>
    %159 = arith.divf %157, %158 : vector<16x1xf32>
    %160 = vector.broadcast %152 : vector<16x1xf32> to vector<16x32xf32>
    %161 = arith.subf %146, %160 : vector<16x32xf32>
    %cst_56 = arith.constant 9.99999974E-6 : f32
    %162 = vector.broadcast %cst_56 : f32 to vector<16x1xf32>
    %163 = arith.addf %159, %162 : vector<16x1xf32>
    %164 = math.rsqrt %163 : vector<16x1xf32>
    %165 = vector.broadcast %164 : vector<16x1xf32> to vector<16x32xf32>
    %166 = arith.mulf %161, %165 : vector<16x32xf32>
    %167 = vector.broadcast %147 : vector<1x32xf32> to vector<16x32xf32>
    %168 = arith.mulf %166, %167 : vector<16x32xf32>
    %169 = vector.broadcast %148 : vector<1x32xf32> to vector<16x32xf32>
    %170 = arith.addf %168, %169 : vector<16x32xf32>
    %c0_57 = arith.constant 0 : index
    %c0_58 = arith.constant 0 : index
    %171 = vector.load %arg16[%c0_57, %c0_58] : memref<16x32xf32, #tpu.memory_space<vmem>>, vector<16x32xf32>
    tpu.vector_store %arg16[%c0_57, %c0_58], %170 {strides = array<i32>} : memref<16x32xf32, #tpu.memory_space<vmem>>, vector<16x32xf32>,
    %c2_i32 = arith.constant 2 : i32
    %172 = arith.cmpi eq, %arg0, %c2_i32 : i32
    %173 = arith.extui %172 : i1 to i32
    %c0_i32_59 = arith.constant 0 : i32
    %174 = arith.cmpi ne, %173, %c0_i32_59 : i32
    scf.if %174 {
      %c0_60 = arith.constant 0 : index
      %c0_61 = arith.constant 0 : index
      %175 = vector.load %arg14[%c0_60, %c0_61] : memref<8x32xf32, #tpu.memory_space<vmem>>, vector<8x32xf32>
      %c0_62 = arith.constant 0 : index
      %c0_63 = arith.constant 0 : index
      %176 = vector.load %arg10[%c0_62, %c0_63] : memref<32x16xf32, #tpu.memory_space<vmem>>, vector<32x16xf32>
      %cst_64 = arith.constant dense<0.000000e+00> : vector<16x16xf32>
      %177 = tpu.matmul %170, %176, %cst_64 {dimension_numbers = #tpu.dot_dimension_numbers<[1], [0], [0], [1], [0, 0, 1, 1], [], []>} : vector<16x32xf32>, vector<32x16xf32>, vector<16x16xf32> -> vector<16x16xf32>
      %178 = vector.extract_strided_slice %175 {offsets = [0, 0], sizes = [1, 16], strides = [1, 1]} : vector<8x32xf32> to vector<1x16xf32>
      %179 = vector.broadcast %178 : vector<1x16xf32> to vector<16x16xf32>
      %180 = arith.addf %177, %179 : vector<16x16xf32>
      %c0_65 = arith.constant 0 : index
      %c0_66 = arith.constant 0 : index
      %181 = vector.load %arg11[%c0_65, %c0_66] : memref<16x2xf32, #tpu.memory_space<vmem>>, vector<16x2xf32>
      %cst_67 = arith.constant dense<0.000000e+00> : vector<16x2xf32>
      %182 = tpu.matmul %180, %181, %cst_67 {dimension_numbers = #tpu.dot_dimension_numbers<[1], [0], [0], [1], [0, 0, 1, 1], [], []>} : vector<16x16xf32>, vector<16x2xf32>, vector<16x2xf32> -> vector<16x2xf32>
      %183 = vector.extract_strided_slice %175 {offsets = [1, 0], sizes = [1, 2], strides = [1, 1]} : vector<8x32xf32> to vector<1x2xf32>
      %184 = vector.broadcast %183 : vector<1x2xf32> to vector<16x2xf32>
      %185 = arith.addf %182, %184 : vector<16x2xf32>
      %cst_68 = arith.constant 0.000000e+00 : f32
      %186 = vector.broadcast %cst_68 : f32 to vector<16x2xf32>
      %187 = arith.subf %186, %185 : vector<16x2xf32>
      %188 = math.exp %187 : vector<16x2xf32>
      %cst_69 = arith.constant 1.000000e+00 : f32
      %189 = vector.broadcast %cst_69 : f32 to vector<16x2xf32>
      %190 = arith.addf %189, %188 : vector<16x2xf32>
      %cst_70 = arith.constant 1.000000e+00 : f32
      %191 = vector.broadcast %cst_70 : f32 to vector<16x2xf32>
      %192 = arith.divf %191, %190 : vector<16x2xf32>
      %193 = tpu.iota {dimensions = array<i32: 1>} : vector<16x2xi32>
      %c0_i32_71 = arith.constant 0 : i32
      %194 = vector.broadcast %c0_i32_71 : i32 to vector<16x2xi32>
      %195 = arith.cmpi eq, %193, %194 : vector<16x2xi32>
      %cst_72 = arith.constant 0.899999976 : f32
      %cst_73 = arith.constant 8.000000e-01 : f32
      %196 = vector.broadcast %cst_72 : f32 to vector<16x2xf32>
      %197 = vector.broadcast %cst_73 : f32 to vector<16x2xf32>
      %198 = arith.select %195, %196, %197 : vector<16x2xi1>, vector<16x2xf32>
      %c0_i32_74 = arith.constant 0 : i32
      %199 = vector.broadcast %c0_i32_74 : i32 to vector<16x2xi32>
      %200 = arith.cmpi eq, %193, %199 : vector<16x2xi32>
      %cst_75 = arith.constant 1.000000e+00 : f32
      %cst_76 = arith.constant 0.899999976 : f32
      %201 = vector.broadcast %cst_75 : f32 to vector<16x2xf32>
      %202 = vector.broadcast %cst_76 : f32 to vector<16x2xf32>
      %203 = arith.select %200, %201, %202 : vector<16x2xi1>, vector<16x2xf32>
      %204 = arith.mulf %192, %198 : vector<16x2xf32>
      %cst_77 = arith.constant 1.000000e-01 : f32
      %205 = vector.broadcast %cst_77 : f32 to vector<16x2xf32>
      %206 = arith.addf %204, %205 : vector<16x2xf32>
      %cst_78 = arith.constant 1.000000e-01 : f32
      %207 = vector.broadcast %cst_78 : f32 to vector<16x2xf32>
      %208 = arith.maximumf %207, %206 : vector<16x2xf32>
      %209 = arith.minimumf %203, %208 : vector<16x2xf32>
      %c0_79 = arith.constant 0 : index
      %c0_80 = arith.constant 0 : index
      %210 = vector.load %arg12[%c0_79, %c0_80] : memref<16x32xf32, #tpu.memory_space<vmem>>, vector<16x32xf32>
      %cst_81 = arith.constant dense<0.000000e+00> : vector<16x32xf32>
      %211 = tpu.matmul %180, %210, %cst_81 {dimension_numbers = #tpu.dot_dimension_numbers<[1], [0], [0], [1], [0, 0, 1, 1], [], []>} : vector<16x16xf32>, vector<16x32xf32>, vector<16x32xf32> -> vector<16x32xf32>
      %212 = vector.extract_strided_slice %175 {offsets = [2, 0], sizes = [1, 32], strides = [1, 1]} : vector<8x32xf32> to vector<1x32xf32>
      %213 = vector.broadcast %212 : vector<1x32xf32> to vector<16x32xf32>
      %214 = arith.addf %211, %213 : vector<16x32xf32>
      %215 = vector.extract_strided_slice %175 {offsets = [3, 0], sizes = [1, 32], strides = [1, 1]} : vector<8x32xf32> to vector<1x32xf32>
      %216 = vector.extract_strided_slice %175 {offsets = [4, 0], sizes = [1, 32], strides = [1, 1]} : vector<8x32xf32> to vector<1x32xf32>
      %cst_82 = arith.constant dense<0.000000e+00> : vector<16xf32>
      %217 = vector.multi_reduction <add>, %214, %cst_82 [1] : vector<16x32xf32> to vector<16xf32>
      %218 = vector.shape_cast %217 : vector<16xf32> to vector<16x1xf32>
      %cst_83 = arith.constant 3.200000e+01 : f32
      %219 = vector.broadcast %cst_83 : f32 to vector<16x1xf32>
      %220 = arith.divf %218, %219 : vector<16x1xf32>
      %221 = vector.broadcast %220 : vector<16x1xf32> to vector<16x32xf32>
      %222 = arith.subf %214, %221 : vector<16x32xf32>
      %223 = arith.mulf %222, %222 : vector<16x32xf32>
      %cst_84 = arith.constant dense<0.000000e+00> : vector<16xf32>
      %224 = vector.multi_reduction <add>, %223, %cst_84 [1] : vector<16x32xf32> to vector<16xf32>
      %225 = vector.shape_cast %224 : vector<16xf32> to vector<16x1xf32>
      %cst_85 = arith.constant 3.200000e+01 : f32
      %226 = vector.broadcast %cst_85 : f32 to vector<16x1xf32>
      %227 = arith.divf %225, %226 : vector<16x1xf32>
      %228 = vector.broadcast %220 : vector<16x1xf32> to vector<16x32xf32>
      %229 = arith.subf %214, %228 : vector<16x32xf32>
      %cst_86 = arith.constant 9.99999974E-6 : f32
      %230 = vector.broadcast %cst_86 : f32 to vector<16x1xf32>
      %231 = arith.addf %227, %230 : vector<16x1xf32>
      %232 = math.rsqrt %231 : vector<16x1xf32>
      %233 = vector.broadcast %232 : vector<16x1xf32> to vector<16x32xf32>
      %234 = arith.mulf %229, %233 : vector<16x32xf32>
      %235 = vector.broadcast %215 : vector<1x32xf32> to vector<16x32xf32>
      %236 = arith.mulf %234, %235 : vector<16x32xf32>
      %237 = vector.broadcast %216 : vector<1x32xf32> to vector<16x32xf32>
      %238 = arith.addf %236, %237 : vector<16x32xf32>
      %cst_87 = arith.constant 0.000000e+00 : f32
      %239 = vector.broadcast %cst_87 : f32 to vector<16x32xf32>
      %240 = arith.maximumf %238, %239 : vector<16x32xf32>
      %c0_88 = arith.constant 0 : index
      %c0_89 = arith.constant 0 : index
      %241 = vector.load %arg13[%c0_88, %c0_89] : memref<32x8xf32, #tpu.memory_space<vmem>>, vector<32x8xf32>
      %cst_90 = arith.constant dense<0.000000e+00> : vector<16x8xf32>
      %242 = tpu.matmul %240, %241, %cst_90 {dimension_numbers = #tpu.dot_dimension_numbers<[1], [0], [0], [1], [0, 0, 1, 1], [], []>} : vector<16x32xf32>, vector<32x8xf32>, vector<16x8xf32> -> vector<16x8xf32>
      %243 = vector.extract_strided_slice %175 {offsets = [5, 0], sizes = [1, 8], strides = [1, 1]} : vector<8x32xf32> to vector<1x8xf32>
      %244 = vector.broadcast %243 : vector<1x8xf32> to vector<16x8xf32>
      %245 = arith.addf %242, %244 : vector<16x8xf32>
      %c0_91 = arith.constant 0 : index
      %c0_92 = arith.constant 0 : index
      %246 = vector.load %arg15[%c0_91, %c0_92] : memref<16x26xf32, #tpu.memory_space<vmem>>, vector<16x8xf32>
      tpu.vector_store %arg15[%c0_91, %c0_92], %245 {strides = array<i32>} : memref<16x26xf32, #tpu.memory_space<vmem>>, vector<16x8xf32>,
      %c0_93 = arith.constant 0 : index
      %c8 = arith.constant 8 : index
      %247 = vector.load %arg15[%c0_93, %c8] : memref<16x26xf32, #tpu.memory_space<vmem>>, vector<16x16xf32>
      tpu.vector_store %arg15[%c0_93, %c8], %180 {strides = array<i32>} : memref<16x26xf32, #tpu.memory_space<vmem>>, vector<16x16xf32>,
      %c0_94 = arith.constant 0 : index
      %c24 = arith.constant 24 : index
      %248 = vector.load %arg15[%c0_94, %c24] : memref<16x26xf32, #tpu.memory_space<vmem>>, vector<16x2xf32>
      tpu.vector_store %arg15[%c0_94, %c24], %209 {strides = array<i32>} : memref<16x26xf32, #tpu.memory_space<vmem>>, vector<16x2xf32>,
    } else {
    }
    return
  }
  func.func @transform_0(%arg0: i32) -> (i32, i32) {
    %c0_i32 = arith.constant 0 : i32
    %c0_i32_0 = arith.constant 0 : i32
    %c0_i32_1 = arith.constant 0 : i32
    return %c0_i32, %c0_i32_0 : i32, i32
  }
  func.func @transform_1(%arg0: i32) -> (i32, i32) {
    %c0_i32 = arith.constant 0 : i32
    %c0_i32_0 = arith.constant 0 : i32
    %c0_i32_1 = arith.constant 0 : i32
    return %c0_i32, %c0_i32_0 : i32, i32
  }
  func.func @transform_2(%arg0: i32) -> (i32, i32) {
    %c0_i32 = arith.constant 0 : i32
    %c0_i32_0 = arith.constant 0 : i32
    %c0_i32_1 = arith.constant 0 : i32
    return %c0_i32, %c0_i32_0 : i32, i32
  }
  func.func @transform_3(%arg0: i32) -> (i32, i32) {
    %c0_i32 = arith.constant 0 : i32
    %c0_i32_0 = arith.constant 0 : i32
    %c0_i32_1 = arith.constant 0 : i32
    return %c0_i32, %c0_i32_0 : i32, i32
  }
  func.func @transform_4(%arg0: i32) -> (i32, i32, i32) {
    %c0_i32 = arith.constant 0 : i32
    %c0_i32_0 = arith.constant 0 : i32
    %c0_i32_1 = arith.constant 0 : i32
    return %arg0, %c0_i32, %c0_i32_0 : i32, i32, i32
  }
  func.func @transform_5(%arg0: i32) -> (i32, i32, i32) {
    %c0_i32 = arith.constant 0 : i32
    %c0_i32_0 = arith.constant 0 : i32
    %c0_i32_1 = arith.constant 0 : i32
    return %arg0, %c0_i32, %c0_i32_0 : i32, i32, i32
  }
  func.func @transform_6(%arg0: i32) -> (i32, i32, i32) {
    %c0_i32 = arith.constant 0 : i32
    %c0_i32_0 = arith.constant 0 : i32
    %c0_i32_1 = arith.constant 0 : i32
    return %arg0, %c0_i32, %c0_i32_0 : i32, i32, i32
  }
  func.func @transform_7(%arg0: i32) -> (i32, i32, i32) {
    %c0_i32 = arith.constant 0 : i32
    %c0_i32_0 = arith.constant 0 : i32
    %c0_i32_1 = arith.constant 0 : i32
    return %arg0, %c0_i32, %c0_i32_0 : i32, i32, i32
  }
  func.func @transform_8(%arg0: i32) -> (i32, i32, i32) {
    %c0_i32 = arith.constant 0 : i32
    %c0_i32_0 = arith.constant 0 : i32
    %c0_i32_1 = arith.constant 0 : i32
    return %arg0, %c0_i32, %c0_i32_0 : i32, i32, i32
  }
  func.func @transform_9(%arg0: i32) -> (i32, i32) {
    %c0_i32 = arith.constant 0 : i32
    %c0_i32_0 = arith.constant 0 : i32
    %c0_i32_1 = arith.constant 0 : i32
    return %c0_i32, %c0_i32_0 : i32, i32
  }
  func.func @transform_10(%arg0: i32) -> (i32, i32) {
    %c0_i32 = arith.constant 0 : i32
    %c0_i32_0 = arith.constant 0 : i32
    %c0_i32_1 = arith.constant 0 : i32
    return %c0_i32, %c0_i32_0 : i32, i32
  }
  func.func @transform_11(%arg0: i32) -> (i32, i32) {
    %c0_i32 = arith.constant 0 : i32
    %c0_i32_0 = arith.constant 0 : i32
    %c0_i32_1 = arith.constant 0 : i32
    return %c0_i32, %c0_i32_0 : i32, i32
  }
  func.func @transform_12(%arg0: i32) -> (i32, i32) {
    %c0_i32 = arith.constant 0 : i32
    %c0_i32_0 = arith.constant 0 : i32
    %c0_i32_1 = arith.constant 0 : i32
    return %c0_i32, %c0_i32_0 : i32, i32
  }
  func.func @transform_13(%arg0: i32) -> (i32, i32) {
    %c0_i32 = arith.constant 0 : i32
    %c0_i32_0 = arith.constant 0 : i32
    %c0_i32_1 = arith.constant 0 : i32
    return %c0_i32, %c0_i32_0 : i32, i32
  }
  func.func @transform_14(%arg0: i32) -> (i32, i32) {
    %c0_i32 = arith.constant 0 : i32
    %c0_i32_0 = arith.constant 0 : i32
    %c0_i32_1 = arith.constant 0 : i32
    return %c0_i32, %c0_i32_0 : i32, i32
  }
}

</mosaic_0001>

<bundles_post_ra>
// kernel: eq.8
= control target key start
LH: loop header
LB: loop body
LE: loop exit
PB: predicated region body
PF: predicated region fallthrough
CT: control target
= control target key end

     0   :  { %vm7_vm0 = vcmask 64512   ;;  %vm13_vm1 = vcmask 130112   ;;  %s39_s0 = inlined_call_operand.vmem [shape: s32[2,8], index: 0, kind: input, shape index: {}]   ;;  %s40_s1 = inlined_call_operand.vmem [shape: s32[16], index: 1, kind: output, shape index: {}]  }
   0x1   :  { %v4_v0 = vld [vmem:[%s39_s0] sm:$0x3]  ;;  %s22_s0 = smov 8  }
   0x2   :  { %5 = vst [vmem:[#allocation1] sm:$0x3] %v4_v0 }
   0x9   :  { %v10_v1 = vld [vmem:[#allocation1 + $0x1] sm:$0x1]   ;;  %v6_v2 = vld [vmem:[#allocation1] sm:$0x1]  }
   0xa   :  { %11 = vrot.lane.b32.xlu0 %v10_v1, %s22_s0  ;;  %8 = vst.msk [vmem:[#allocation0] sm:$0x1] %vm7_vm0, %v6_v2  }
  0x7c   :  { %v12_v3 = vpop.permute.xlu0 %11  }
  0x7d   :  { %14 = vst.msk [vmem:[#allocation0] sm:$0x1] %vm13_vm1, %v12_v3  }
  0x84   :  { %v18_v4 = vld [vmem:[#allocation0] sm:$0x1] }
  0x85   :  { %20 = vst [vmem:[%s40_s1] sm:$0x1] %v18_v4 }

// kernel: llm_transformer_agent_forward.1
= control target key start
LH: loop header
LB: loop body
LE: loop exit
PB: predicated region body
PF: predicated region fallthrough
CT: control target
= control target key end

     0   :  { %s3333_s29 = smov 0   ;;  %s3693_s0 = inlined_call_operand.vmem [shape: f32[16,16], index: 0, kind: input, shape index: {}]   ;;  %s3694_s1 = inlined_call_operand.vmem [shape: f32[16,32], index: 1, kind: input, shape index: {}]   ;;  %s3695_s2 = inlined_call_operand.vmem [shape: f32[16,32], index: 2, kind: input, shape index: {}]   ;;  %s3696_s3 = inlined_call_operand.vmem [shape: f32[16,16], index: 3, kind: input, shape index: {}]   ;;  %s3697_s4 = inlined_call_operand.vmem [shape: f32[3,32,128], index: 4, kind: input, shape index: {}]   ;;  %s3698_s5 = inlined_call_operand.vmem [shape: f32[3,32,32], index: 5, kind: input, shape index: {}]   ;;  %s3699_s6 = inlined_call_operand.vmem [shape: f32[3,32,128], index: 6, kind: input, shape index: {}]   ;;  %s3700_s7 = inlined_call_operand.vmem [shape: f32[3,128,32], index: 7, kind: input, shape index: {}]   ;;  %s3701_s8 = inlined_call_operand.vmem [shape: f32[3,8,128], index: 8, kind: input, shape index: {}]   ;;  %s3702_s9 = inlined_call_operand.vmem [shape: f32[32,16], index: 9, kind: input, shape index: {}]   ;;  %s3703_s10 = inlined_call_operand.vmem [shape: f32[16,2], index: 10, kind: input, shape index: {}]   ;;  %s3704_s11 = inlined_call_operand.vmem [shape: f32[16,32], index: 11, kind: input, shape index: {}]   ;;  %s3705_s12 = inlined_call_operand.vmem [shape: f32[32,8], index: 12, kind: input, shape index: {}]   ;;  %s3706_s13 = inlined_call_operand.vmem [shape: f32[8,32], index: 13, kind: input, shape index: {}]   ;;  %s3707_s14 = inlined_call_operand.vmem [shape: f32[16,26], index: 14, kind: output, shape index: {}]  }
   0x1   :  { %3711 = sst [smem:[#allocation4_spill]] %s3705_s12 }
   0x2   :  { %3712 = sst [smem:[#allocation5_spill]] %s3707_s14 }
   0x3 LB: > { %3713 = sst [smem:[#allocation3_spill]] %s3241_s29  ;;  %s3339_s30 = sadd.s32 4294967295, %s3241_s29   ;;  %s3241_s29 = sphi %s3333_s29, %s24_s29  }
   0x4   : > { %p2660_p0 = scmp.ge.s32.totalorder %s3241_s29, 1  ;;  %p446_p1 = scmp.lt.s32.totalorder %s3241_s29, 4 }
   0x6   : > { %p447_p2 = pnand %p2660_p0, %p446_p1 }
   0x7   : > { %p506_p3 = scmp.lt.s32.totalorder (!%p447_p2), %s3339_s30, 2  ;;  %p2670_p4 = scmp.ne.s32.totalorder (!%p447_p2), %s3339_s30, 0 }
   0x8   : > { %450 = sbr.rel (%p447_p2) target bundleno = 4907 (0x132b), region = 76 }
   0xf   : > { %s507_s15 = scalar_select %p506_p3, %s3339_s30, 2 }
  0x10   : > { %533 = sbr.rel (%p2670_p4) target bundleno = 239 (0xef), region = 80  ;;  %v536_v0 = vld [vmem:[%s3695_s2] sm:$0xff] (!%p2670_p4)  ;;  %v537_v1 = vld [vmem:[%s3695_s2 + $0x8] sm:$0xff] (!%p2670_p4)  ;;  %vm540_vm0 = vcmask (!%p2670_p4), 130048   ;;  %vm622_vm1 = vcmask (!%p2670_p4), 261120  }
  0x11   : > { %s2720_s16 = sshll.u32 %s507_s15, 5  ;;  %s2723_s17 = sshll.u32 %s507_s15, 7  ;;  %v534_v2 = vld [vmem:[%s3693_s0] sm:$0xff] (!%p2670_p4)  ;;  %v2998_v3 = vpack.c.bf16 (!%p2670_p4), %v537_v1, %v536_v0  ;;  %v535_v4 = vld [vmem:[%s3693_s0 + $0x8] sm:$0xff] (!%p2670_p4) }
  0x12   : > { %s3348_s20 = scalar_lea.vmem %s3697_s4, %s2720_s16  ;;  %s3353_s23 = scalar_lea.vmem %s3698_s5, %s2720_s16  ;;  %2826 = vmatprep.mubr.msk.f32.mxu0 (!%p2670_p4), %vm540_vm0, %v534_v2  ;;  %v539_v5 = vld [vmem:[%s3694_s1 + $0x8] sm:$0xff] (!%p2670_p4)  ;;  %v538_v6 = vld [vmem:[%s3694_s1] sm:$0xff] (!%p2670_p4) }
  0x13   : > { %s3358_s26 = scalar_lea.vmem %s3699_s6, %s2720_s16  ;;  %s3363_s29 = scalar_lea.vmem %s3700_s7, %s2723_s17  ;;  %2999 = vmatprep.subr.bf16.mxu0 (!%p2670_p4), %v2998_v3 }
  0x14   : > { %s2669_s14 = sshll.u32 %s507_s15, 3  ;;  %3001 = vmatpush3.bf16.msra.mxu0 (!%p2670_p4), %v2998_v3 }
  0x15   : > { %s3368_s19 = scalar_lea.vmem %s3701_s8, %s2669_s14 }
  0x17   : > { %2827 = vmatmul.mubr.msk.f32.vlgmr.msra.gmra.mrb[0].mxu0 %vm540_vm0, %v535_v4 }
  0xea   : > { %v2828_v7 = vpop.f32.mrb[0].mxu0 }
  0xeb   : > { %v619_v8 = vadd.f32 %v2828_v7, %v539_v5  ;;  %v613_v9 = vpop.f32.mrb[1].mxu0 }
  0xec   : > { %v614_v10 = vadd.f32 %v613_v9, %v538_v6 }
  0xed   : > { %624 = vst.msk [vmem:[#allocation2 + $0x8] sm:$0xff] %vm622_vm1, %v619_v8 }
  0xee   : > { %623 = vst.msk [vmem:[#allocation2] sm:$0xff] %vm622_vm1, %v614_v10 }
  0xef PF: > { %v628_v11 = vld [vmem:[%s3348_s20] sm:$0xff]  ;;  %v629_v12 = vld [vmem:[%s3348_s20 + $0x8] sm:$0xff]  ;;  %v630_v13 = vld [vmem:[%s3348_s20 + $0x10] sm:$0xff]  ;;  %vm636_vm2 = vcmask 261120   ;;  %v632_v19 = vlaneseq  ;;  %vm730_vm3 = vcmask 64512   ;;  %vm818_vm5 = vcmask 130048  }
  0xf0   : > { %v3002_v14 = vpack.c.bf16 %v629_v12, %v628_v11  ;;  %v631_v15 = vld [vmem:[%s3348_s20 + $0x18] sm:$0xff]  ;;  %v3406_v22 = vld [vmem:[%s3368_s19] sm:$0xff]  ;;  %s3243_s20 = smov 96   ;;  %vm3424_vm4 = vmpackc.low %vm730_vm3, %vm730_vm3  ;;  %s3244_s24 = smov 64  }
  0xf1   : > { %v3006_v17 = vpack.c.bf16 %v631_v15, %v630_v13  ;;  %v3402_v20 = vshrl.u32 %v632_v19, 7  ;;  %v3437_v35 = vld [vmem:[%s3696_s3 + $0x8] sm:$0xff]  ;;  %v3442_v38 = vld [vmem:[%s3696_s3] sm:$0xff]  ;;  %s3245_s25 = smov 88   ;;  %s3246_s17 = smov 120  }
  0xf2   : > { %3003 = vmatprep.subr.bf16.mxu1 %v3002_v14  ;;  %s3247_s12 = smov 56   ;;  %s3248_s14 = smov 80  }
  0xf3   : > { %3005 = vmatpush3.bf16.msra.mxu1 %v3002_v14  ;;  %v634_v21 = vsub.s32 0, %v3402_v20  ;;  %s3249_s15 = smov 112   ;;  %s3250_s27 = smov 104  }
  0xf4   : > { %3007 = vmatprep.subr.bf16.mxu1 %v3006_v17  ;;  %v3397_v18 = vld [vmem:[#allocation2 + $0x8] sm:$0xff]  ;;  %s3251_s28 = smov 72   ;;  %s3252_s18 = smov 48  }
  0xf5   : > { %v3393_v16 = vld [vmem:[#allocation2] sm:$0xff]  ;;  %v635_v23 = vrot.slane %v3406_v22, %v634_v21  ;;  %p2709_p5 = scmp.ne.s32.totalorder %s3339_s30, 2 }
  0xf6   : > { %2837 = vmatprep.mubr.msk.f32.mxu1 %vm636_vm2, %v3393_v16  ;;  %s3716_s21 = sld [smem:[#allocation4_spill]] (!%p2709_p5)  ;;  %vm2567_vm7 = vcmask (!%p2709_p5), 195648   ;;  %vm2578_vm8 = vcmask (!%p2709_p5), 212160  }
  0xf7   : > { %3009 = vmatpush3.bf16.msra.mxu1 %v3006_v17 }
  0xfa   : > { %2838 = vmatmul.mubr.msk.f32.vlgmr.msra.gmra.mrb[0].mxu1 %vm636_vm2, %v3397_v18 }
 0x1cd   : > { %v2839_v24 = vpop.f32.mrb[0].mxu1 }
 0x1ce   : > { %v3411_v25 = vadd.f32 %v2839_v24, %v635_v23  ;;  %v709_v26 = vpop.f32.mrb[1].mxu1 }
 0x1cf   : > { %v3413_v27 = vadd.f32 %v709_v26, %v635_v23 }
 0x1d1   : > { %2844 = vmatprep.mubr.msk.f32.mxu1 %vm730_vm3, %v3413_v27  ;;  %v3419_v28 = vpack.i.bf16 %v3411_v25, %v3413_v27 }
 0x1d3   : > { %3144 = vrot.lane.b32.xlu0 %v3419_v28, %s3243_s20  ;;  %s3253_s20 = smov 40  }
 0x245   : > { %v3145_v29 = vpop.permute.xlu0 %3144 }
 0x246   : > { %v3147_v30 = vunpack.i.h.bf16 %v3145_v29  ;;  %v3146_v31 = vunpack.i.l.bf16 %v3145_v29 }
 0x248   : > { %v3010_v33 = vpack.c.bf16 %v3147_v30, %v3146_v31 }
 0x24a   : > { %3012 = vmatprep.subr.msk.bf16.mxu1 %vm3424_vm4, %v3010_v33 }
 0x24b   : > { %3015 = vmatpush3.bf16.xpose.msk.msra.mxu1 %vm3424_vm4, %v3010_v33 }
 0x252   : > { %2845 = vmatmul.mubr.msk.f32.vlgmr.msra.gmra.mrb[2].mxu1 %vm730_vm3, %v3411_v25 }
 0x325   : > { %v2846_v34 = vpop.f32.mrb[2].mxu1 }
 0x326   : > { %v815_v36 = vmul.f32 0.35355338, %v2846_v34  ;;  %v805_v37 = vpop.f32.mrb[3].mxu1 }
 0x327   : > { %v814_v39 = vmul.f32 0.35355338, %v805_v37 }
 0x328   : > { %v817_v40 = vadd.f32 %v815_v36, %v3437_v35 }
 0x329   : > { %v816_v41 = vadd.f32 %v814_v39, %v3442_v38 }
 0x32a   : > { %v822_v42 = vsel %vm818_vm5, %v817_v40, -inf }
 0x32b   : > { %823 = vmax.xlane.f32.xlu1 %v822_v42  ;;  %v819_v43 = vsel %vm818_vm5, %v816_v41, -inf }
 0x32c   : > { %820 = vmax.xlane.f32.xlu0 %v819_v43 }
 0x33c   : > { %3149 = vrot.lane.b32.xlu1 %v3419_v28, %s3244_s24 }
 0x340   : > { %3154 = vrot.lane.b32.xlu1 %v3419_v28, %s3245_s25 }
 0x342   : > { %930 = vrot.lane.b32.xlu0 %v3411_v25, %s3246_s17 }
 0x3b8   : > { %v824_v44 = vpop.xlane.xlu1 %823 }
 0x3b9   : > { %v826_v45 = vsub.f32 %v817_v40, %v824_v44  ;;  %v821_v46 = vpop.xlane.xlu0 %820 }
 0x3ba   : > { %v825_v47 = vsub.f32 %v816_v41, %v821_v46 }
 0x3bb   : > { %v829_v48 = vmul.f32 1.442695, %v826_v45 }
 0x3bc   : > { %v827_v49 = vmul.f32 1.442695, %v825_v47  ;;  %v3150_v50 = vpop.permute.xlu1 %3149 }
 0x3bd   : > { %3183 = vpow2.f32 %v829_v48  ;;  %v3152_v51 = vunpack.i.h.bf16 %v3150_v50  ;;  %v3151_v52 = vunpack.i.l.bf16 %v3150_v50  ;;  %v931_v5 = vpop.permute.xlu0 %930 }
 0x3be   : > { %3185 = vpow2.f32 %v827_v49 }
 0x3bf   : > { %v3016_v53 = vpack.c.bf16 %v3152_v51, %v3151_v52 }
 0x3c0   : > { %v3155_v54 = vpop.permute.xlu1 %3154 }
 0x3c1   : > { %v3157_v55 = vunpack.i.h.bf16 %v3155_v54  ;;  %v3156_v56 = vunpack.i.l.bf16 %v3155_v54  ;;  %3017 = vmatprep.subr.bf16.mxu1 %v3016_v53 }
 0x3c2   : > { %3019 = vmatpush3.bf16.msra.mxu1 %v3016_v53 }
 0x3c3   : > { %v3020_v57 = vpack.c.bf16 %v3157_v55, %v3156_v56 }
 0x3c5   : > { %3022 = vmatprep.subr.msk.bf16.mxu1 %vm3424_vm4, %v3020_v57 }
 0x3c7   : > { %v3184_v58 = vpop.eup %3183 }
 0x3c8   : > { %v834_v59 = vsel %vm818_vm5, %v3184_v58, 0.0  ;;  %v3186_v60 = vpop.eup %3185 }
 0x3c9   : > { %835 = vadd.xlane.f32.xlu1 %v834_v59  ;;  %v831_v61 = vsel %vm818_vm5, %v3186_v60, 0.0  ;;  %v718_v59 = vld [vmem:[%s3353_s23] sm:$0xff] }
 0x3cd   : > { %832 = vadd.xlane.f32.xlu1 %v831_v61 }
 0x3de   : > { %928 = vrot.lane.b32.xlu1 %v3413_v27, %s3246_s17 }
 0x456   : > { %v836_v62 = vpop.xlane.xlu1 %835 }
 0x457   : > { %3187 = vrcp.f32 %v836_v62 }
 0x45a   : > { %v833_v63 = vpop.xlane.xlu1 %832 }
 0x45b   : > { %3189 = vrcp.f32 %v833_v63 }
 0x45e   : > { %v929_v4 = vpop.permute.xlu1 %928 }
 0x461   : > { %v3188_v0 = vpop.eup %3187 }
 0x462   : > { %v840_v3 = vmul.f32 %v3188_v0, %v3184_v58  ;;  %v719_v58 = vld [vmem:[%s3353_s23 + $0x8] sm:$0xff] }
 0x463   : > { %2868 = vmatprep.subr.mxu0 %v719_v58 }
 0x464   : > { %2869 = vmatpush3.msra.mxu0 %v719_v58 }
 0x465   : > { %v3190_v1 = vpop.eup %3189  ;;  %2873 = vmatprep.subr.mxu0 %v718_v59 }
 0x466   : > { %v839_v2 = vmul.f32 %v3190_v1, %v3186_v60 }
 0x468   : > { %2851 = vmatprep.mubr.msk.f32.mxu1 %vm818_vm5, %v839_v2 }
 0x469   : > { %2852 = vmatmul.mubr.msk.f32.vlgmr.msra.gmra.mrb[4].mxu1 %vm818_vm5, %v840_v3 }
 0x46a   : > { %3025 = vmatpush3.bf16.xpose.msk.msra.mxu1 %vm3424_vm4, %v3020_v57  ;;  %2858 = vmatprep.mubr.msk.f32.mxu1 %vm730_vm3, %v929_v4 }
 0x471   : > { %2859 = vmatmul.mubr.msk.f32.vlgmr.msra.gmra.mrb[6].mxu1 %vm730_vm3, %v931_v5 }
 0x53c   : > { %v3462_v6 = vpop.f32.mrb[4].mxu1 }
 0x53d   : > { %v3464_v7 = vpop.f32.mrb[5].mxu1 }
 0x544   : > { %v2860_v8 = vpop.f32.mrb[6].mxu1 }
 0x545   : > { %v1020_v9 = vmul.f32 0.35355338, %v2860_v8  ;;  %v1010_v10 = vpop.f32.mrb[7].mxu1 }
 0x546   : > { %v1019_v11 = vmul.f32 0.35355338, %v1010_v10 }
 0x547   : > { %v1022_v12 = vadd.f32 %v1020_v9, %v3437_v35 }
 0x548   : > { %v1021_v13 = vadd.f32 %v1019_v11, %v3442_v38 }
 0x549   : > { %v1026_v14 = vsel %vm818_vm5, %v1022_v12, -inf }
 0x54a   : > { %1027 = vmax.xlane.f32.xlu0 %v1026_v14  ;;  %v1023_v15 = vsel %vm818_vm5, %v1021_v13, -inf }
 0x54b   : > { %1024 = vmax.xlane.f32.xlu1 %v1023_v15 }
 0x55c   : > { %3159 = vrot.lane.b32.xlu1 %v3419_v28, %s3247_s12 }
 0x560   : > { %3164 = vrot.lane.b32.xlu0 %v3419_v28, %s3248_s14  ;;  %1294 = vrot.lane.b32.xlu1 %v3413_v27, %s3249_s15 }
 0x564   : > { %1581 = vrot.lane.b32.xlu0 %v3413_v27, %s3250_s27 }
 0x5d7   : > { %v1028_v17 = vpop.xlane.xlu0 %1027 }
 0x5d8   : > { %v1030_v23 = vsub.f32 %v1022_v12, %v1028_v17  ;;  %v1025_v24 = vpop.xlane.xlu1 %1024 }
 0x5d9   : > { %v1029_v26 = vsub.f32 %v1021_v13, %v1025_v24 }
 0x5da   : > { %v1033_v29 = vmul.f32 1.442695, %v1030_v23 }
 0x5db   : > { %v1031_v30 = vmul.f32 1.442695, %v1029_v26  ;;  %v3165_v31 = vpop.permute.xlu0 %3164 }
 0x5dc   : > { %3191 = vpow2.f32 %v1033_v29  ;;  %v3160_v33 = vpop.permute.xlu1 %3159  ;;  %v3167_v34 = vunpack.i.h.bf16 %v3165_v31  ;;  %v3166_v36 = vunpack.i.l.bf16 %v3165_v31 }
 0x5dd   : > { %v3162_v37 = vunpack.i.h.bf16 %v3160_v33  ;;  %v3161_v39 = vunpack.i.l.bf16 %v3160_v33  ;;  %3193 = vpow2.f32 %v1031_v30 }
 0x5de   : > { %v3030_v41 = vpack.c.bf16 %v3167_v34, %v3166_v36 }
 0x5df   : > { %v3026_v40 = vpack.c.bf16 %v3162_v37, %v3161_v39  ;;  %v720_v37 = vld [vmem:[%s3353_s23 + $0x10] sm:$0xff] }
 0x5e0   : > { %v1295_v45 = vpop.permute.xlu1 %1294 }
 0x5e1   : > { %3027 = vmatprep.subr.bf16.mxu1 %v3026_v40 }
 0x5e2   : > { %3029 = vmatpush3.bf16.msra.mxu1 %v3026_v40 }
 0x5e3   : > { %3032 = vmatprep.subr.msk.bf16.mxu1 %vm3424_vm4, %v3030_v41 }
 0x5e6   : > { %v3192_v27 = vpop.eup %3191 }
 0x5e7   : > { %v1038_v42 = vsel %vm818_vm5, %v3192_v27, 0.0  ;;  %v3194_v43 = vpop.eup %3193 }
 0x5e8   : > { %1039 = vadd.xlane.f32.xlu1 %v1038_v42  ;;  %v1035_v44 = vsel %vm818_vm5, %v3194_v43, 0.0 }
 0x5ec   : > { %1036 = vadd.xlane.f32.xlu1 %v1035_v44 }
 0x5fd   : > { %1296 = vrot.lane.b32.xlu1 %v3411_v25, %s3249_s15  ;;  %s3717_s15 = sld [smem:[#allocation5_spill]] (!%p2709_p5) }
 0x601   : > { %3169 = vrot.lane.b32.xlu1 %v3419_v28, %s3251_s28 }
 0x605   : > { %1583 = vrot.lane.b32.xlu1 %v3411_v25, %s3250_s27  ;;  %v1582_v25 = vpop.permute.xlu0 %1581 }
 0x675   : > { %v1040_v46 = vpop.xlane.xlu1 %1039 }
 0x676   : > { %3195 = vrcp.f32 %v1040_v46 }
 0x679   : > { %v1037_v47 = vpop.xlane.xlu1 %1036 }
 0x67a   : > { %3197 = vrcp.f32 %v1037_v47 }
 0x67d   : > { %v1297_v48 = vpop.permute.xlu1 %1296 }
 0x680   : > { %v3196_v50 = vpop.eup %3195 }
 0x681   : > { %v3170_v49 = vpop.permute.xlu1 %3169  ;;  %v1044_v55 = vmul.f32 %v3196_v50, %v3192_v27 }
 0x682   : > { %v3172_v52 = vunpack.i.h.bf16 %v3170_v49  ;;  %v3171_v53 = vunpack.i.l.bf16 %v3170_v49 }
 0x684   : > { %v3198_v51 = vpop.eup %3197  ;;  %v3040_v56 = vpack.c.bf16 %v3172_v52, %v3171_v53 }
 0x685   : > { %v1043_v54 = vmul.f32 %v3198_v51, %v3194_v43  ;;  %v1584_v57 = vpop.permute.xlu1 %1583 }
 0x687   : > { %2865 = vmatprep.mubr.msk.f32.mxu1 %vm818_vm5, %v1043_v54 }
 0x688   : > { %2866 = vmatmul.mubr.msk.f32.vlgmr.msra.gmra.mrb[8].mxu1 %vm818_vm5, %v1044_v55 }
 0x689   : > { %3035 = vmatpush3.bf16.xpose.msk.msra.mxu1 %vm3424_vm4, %v3030_v41  ;;  %2882 = vmatprep.mubr.msk.f32.mxu1 %vm730_vm3, %v1295_v45 }
 0x68a   : > { %3042 = vmatprep.subr.msk.bf16.mxu1 %vm3424_vm4, %v3040_v56 }
 0x690   : > { %2883 = vmatmul.mubr.msk.f32.vlgmr.msra.gmra.mrb[10].mxu1 %vm730_vm3, %v1297_v48 }
 0x691   : > { %3045 = vmatpush3.bf16.xpose.msk.msra.mxu1 %vm3424_vm4, %v3040_v56  ;;  %2901 = vmatprep.mubr.msk.f32.mxu1 %vm730_vm3, %v1582_v25 }
 0x698   : > { %2902 = vmatmul.mubr.msk.f32.vlgmr.msra.gmra.mrb[12].mxu1 %vm730_vm3, %v1584_v57 }
 0x75b   : > { %v2867_v60 = vpop.f32.mrb[8].mxu1 }
 0x75c   : > { %v1123_v61 = vpop.f32.mrb[9].mxu1 }
 0x75d   : > { %2870 = vmatprep.mubr.msk.f32.mxu0 %vm730_vm3, %v1123_v61 }
 0x75e   : > { %2871 = vmatmul.mubr.msk.f32.vlgmr.msra.gmra.mrb[0].mxu0 %vm730_vm3, %v2867_v60 }
 0x75f   : > { %2875 = vmatprep.mubr.msk.f32.mxu0 %vm730_vm3, %v3464_v7  ;;  %2874 = vmatpush3.msra.mxu0 %v718_v59 }
 0x763   : > { %v2884_v32 = vpop.f32.mrb[10].mxu1 }
 0x764   : > { %v1386_v62 = vmul.f32 0.35355338, %v2884_v32  ;;  %v1376_v63 = vpop.f32.mrb[11].mxu1  ;;  %v721_v32 = vld [vmem:[%s3353_s23 + $0x18] sm:$0xff]  ;;  %s3257_s23 = smov (!%p2709_p5), 24  }
 0x765   : > { %v1385_v0 = vmul.f32 0.35355338, %v1376_v63 }
 0x766   : > { %2876 = vmatmul.mubr.msk.f32.vlgmr.msra.gmra.mrb[0].mxu0 %vm730_vm3, %v3462_v6  ;;  %v1388_v1 = vadd.f32 %v1386_v62, %v3437_v35 }
 0x767   : > { %v1387_v2 = vadd.f32 %v1385_v0, %v3442_v38 }
 0x768   : > { %v1392_v3 = vsel %vm818_vm5, %v1388_v1, -inf }
 0x769   : > { %1393 = vmax.xlane.f32.xlu1 %v1392_v3  ;;  %v1389_v4 = vsel %vm818_vm5, %v1387_v2, -inf }
 0x76a   : > { %1390 = vmax.xlane.f32.xlu0 %v1389_v4 }
 0x76b   : > { %v2903_v5 = vpop.f32.mrb[12].mxu1 }
 0x76c   : > { %v1663_v7 = vpop.f32.mrb[13].mxu1  ;;  %v1673_v29 = vmul.f32 0.35355338, %v2903_v5 }
 0x76d   : > { %v1672_v24 = vmul.f32 0.35355338, %v1663_v7 }
 0x76e   : > { %v1675_v34 = vadd.f32 %v1673_v29, %v3437_v35 }
 0x76f   : > { %v1674_v31 = vadd.f32 %v1672_v24, %v3442_v38 }
 0x770   : > { %v1679_v36 = vsel %vm818_vm5, %v1675_v34, -inf }
 0x771   : > { %v1676_v33 = vsel %vm818_vm5, %v1674_v31, -inf }
 0x77a   : > { %3174 = vrot.lane.b32.xlu1 %v3419_v28, %s3252_s18 }
 0x77e   : > { %3179 = vrot.lane.b32.xlu1 %v3419_v28, %s3253_s20 }
 0x7f6   : > { %v1394_v8 = vpop.xlane.xlu1 %1393 }
 0x7f7   : > { %v1396_v6 = vsub.f32 %v1388_v1, %v1394_v8  ;;  %v1391_v9 = vpop.xlane.xlu0 %1390  ;;  %v1870_v1 = vsub.s32 1, %v3402_v20 }
 0x7f8   : > { %v1395_v10 = vsub.f32 %v1387_v2, %v1391_v9 }
 0x7f9   : > { %v1399_v11 = vmul.f32 1.442695, %v1396_v6  ;;  %v1871_v2 = vrot.slane %v3406_v22, %v1870_v1 }
 0x7fa   : > { %v1397_v12 = vmul.f32 1.442695, %v1395_v10  ;;  %v3175_v13 = vpop.permute.xlu1 %3174 }
 0x7fb   : > { %v3177_v14 = vunpack.i.h.bf16 %v3175_v13  ;;  %v3176_v15 = vunpack.i.l.bf16 %v3175_v13 }
 0x7fc   : > { %3199 = vpow2.f32 %v1397_v12 }
 0x7fd   : > { %v3036_v17 = vpack.c.bf16 %v3177_v14, %v3176_v15  ;;  %3201 = vpow2.f32 %v1399_v11 }
 0x7fe   : > { %v3180_v43 = vpop.permute.xlu1 %3179 }
 0x7ff   : > { %3037 = vmatprep.subr.bf16.mxu0 %v3036_v17  ;;  %v3182_v35 = vunpack.i.h.bf16 %v3180_v43  ;;  %v3181_v47 = vunpack.i.l.bf16 %v3180_v43 }
 0x800   : > { %3039 = vmatpush3.bf16.msra.mxu0 %v3036_v17 }
 0x801   : > { %2892 = vmatprep.subr.mxu0 %v720_v37  ;;  %v3046_v51 = vpack.c.bf16 %v3182_v35, %v3181_v47  ;;  %v2015_v35 = vld [vmem:[%s3363_s29 + $0x48] sm:$0xff] }
 0x806   : > { %v3200_v23 = vpop.eup %3199 }
 0x807   : > { %v1401_v26 = vsel %vm818_vm5, %v3200_v23, 0.0  ;;  %v3202_v28 = vpop.eup %3201 }
 0x808   : > { %1402 = vadd.xlane.f32.xlu0 %v1401_v26  ;;  %v1404_v30 = vsel %vm818_vm5, %v3202_v28, 0.0  ;;  %v1915_v26 = vld [vmem:[%s3358_s26] sm:$0xff] }
 0x80c   : > { %1405 = vadd.xlane.f32.xlu0 %v1404_v30  ;;  %v1917_v30 = vld [vmem:[%s3358_s26 + $0x10] sm:$0xff] }
 0x810   : > { %1677 = vmax.xlane.f32.xlu0 %v1676_v33 }
 0x814   : > { %1680 = vmax.xlane.f32.xlu0 %v1679_v36  ;;  %v2007_v36 = vld [vmem:[%s3363_s29 + $0x8] sm:$0xff] }
 0x895   : > { %v1403_v39 = vpop.xlane.xlu0 %1402 }
 0x896   : > { %3203 = vrcp.f32 %v1403_v39 }
 0x899   : > { %v1406_v40 = vpop.xlane.xlu0 %1405 }
 0x89a   : > { %3205 = vrcp.f32 %v1406_v40  ;;  %v2009_v40 = vld [vmem:[%s3363_s29 + $0x18] sm:$0xff] }
 0x89d   : > { %v1678_v41 = vpop.xlane.xlu0 %1677 }
 0x89e   : > { %v1682_v27 = vsub.f32 %v1674_v31, %v1678_v41  ;;  %v1918_v31 = vld [vmem:[%s3358_s26 + $0x18] sm:$0xff] }
 0x89f   : > { %v3054_v33 = vpack.c.bf16 %v1918_v31, %v1917_v30 }
 0x8a0   : > { %v3204_v42 = vpop.eup %3203  ;;  %v1684_v38 = vmul.f32 1.442695, %v1682_v27  ;;  %v2010_v27 = vld [vmem:[%s3363_s29 + $0x20] sm:$0xff] }
 0x8a1   : > { %v1681_v44 = vpop.xlane.xlu0 %1680  ;;  %v1409_v45 = vmul.f32 %v3204_v42, %v3200_v23  ;;  %v2011_v42 = vld [vmem:[%s3363_s29 + $0x28] sm:$0xff] }
 0x8a2   : > { %3207 = vpow2.f32 %v1684_v38  ;;  %v1683_v46 = vsub.f32 %v1675_v34, %v1681_v44  ;;  %v2006_v34 = vld [vmem:[%s3363_s29] sm:$0xff]  ;;  %v3066_v43 = vpack.c.bf16 %v2011_v42, %v2010_v27  ;;  %v2012_v38 = vld [vmem:[%s3363_s29 + $0x30] sm:$0xff]  ;;  %v2013_v44 = vld [vmem:[%s3363_s29 + $0x38] sm:$0xff] }
 0x8a3   : > { %2889 = vmatprep.mubr.msk.f32.mxu0 %vm818_vm5, %v1409_v45  ;;  %v3058_v39 = vpack.c.bf16 %v2007_v36, %v2006_v34  ;;  %v3070_v45 = vpack.c.bf16 %v2013_v44, %v2012_v38 }
 0x8a4   : > { %v3206_v48 = vpop.eup %3205  ;;  %v1686_v49 = vmul.f32 1.442695, %v1683_v46  ;;  %v2014_v46 = vld [vmem:[%s3363_s29 + $0x40] sm:$0xff] }
 0x8a5   : > { %v1410_v50 = vmul.f32 %v3206_v48, %v3202_v28  ;;  %v1916_v28 = vld [vmem:[%s3358_s26 + $0x8] sm:$0xff]  ;;  %v3074_v47 = vpack.c.bf16 %v2015_v35, %v2014_v46  ;;  %v2016_v48 = vld [vmem:[%s3363_s29 + $0x50] sm:$0xff] }
 0x8a6   : > { %3209 = vpow2.f32 %v1686_v49  ;;  %v3050_v29 = vpack.c.bf16 %v1916_v28, %v1915_v26  ;;  %v2017_v49 = vld [vmem:[%s3363_s29 + $0x58] sm:$0xff] }
 0x8a7   : > { %2890 = vmatmul.mubr.msk.f32.vlgmr.msra.gmra.mrb[2].mxu0 %vm818_vm5, %v1410_v50  ;;  %v3078_v50 = vpack.c.bf16 %v2017_v49, %v2016_v48 }
 0x8a8   : > { %2893 = vmatpush3.msra.mxu0 %v720_v37  ;;  %3051 = vmatprep.subr.bf16.mxu1 %v3050_v29  ;;  %v2008_v37 = vld [vmem:[%s3363_s29 + $0x10] sm:$0xff] }
 0x8a9   : > { %3047 = vmatprep.subr.bf16.mxu0 %v3046_v51  ;;  %3053 = vmatpush3.bf16.msra.mxu1 %v3050_v29  ;;  %v3062_v41 = vpack.c.bf16 %v2009_v40, %v2008_v37 }
 0x8aa   : > { %3055 = vmatprep.subr.bf16.mxu1 %v3054_v33 }
 0x8ac   : > { %v3208_v52 = vpop.eup %3207 }
 0x8ad   : > { %v1688_v53 = vsel %vm818_vm5, %v3208_v52, 0.0  ;;  %3057 = vmatpush3.bf16.msra.mxu1 %v3054_v33 }
 0x8ae   : > { %1689 = vadd.xlane.f32.xlu0 %v1688_v53 }
 0x8b0   : > { %v3210_v54 = vpop.eup %3209 }
 0x8b1   : > { %v1691_v55 = vsel %vm818_vm5, %v3210_v54, 0.0 }
 0x8b2   : > { %1692 = vadd.xlane.f32.xlu0 %v1691_v55 }
 0x93b   : > { %v1690_v56 = vpop.xlane.xlu0 %1689 }
 0x93c   : > { %3211 = vrcp.f32 %v1690_v56 }
 0x93f   : > { %v1693_v25 = vpop.xlane.xlu0 %1692 }
 0x940   : > { %3213 = vrcp.f32 %v1693_v25 }
 0x946   : > { %v3212_v57 = vpop.eup %3211 }
 0x947   : > { %v1696_v61 = vmul.f32 %v3212_v57, %v3208_v52  ;;  %v2019_v52 = vld [vmem:[%s3363_s29 + $0x68] sm:$0xff] }
 0x94a   : > { %v3214_v60 = vpop.eup %3213 }
 0x94b   : > { %v1697_v62 = vmul.f32 %v3214_v60, %v3210_v54  ;;  %v1911_v60 = vsub.s32 3, %v3402_v20 }
 0x97a   : > { %v2891_v58 = vpop.f32.mrb[2].mxu0 }
 0x97b   : > { %v1489_v59 = vpop.f32.mrb[3].mxu0 }
 0x97c   : > { %2894 = vmatprep.mubr.msk.f32.mxu0 %vm730_vm3, %v1489_v59  ;;  %v1905_v59 = vsub.s32 2, %v3402_v20 }
 0x97d   : > { %2895 = vmatmul.mubr.msk.f32.vlgmr.msra.gmra.mrb[0].mxu0 %vm730_vm3, %v2891_v58 }
 0x97e   : > { %3049 = vmatpush3.bf16.msra.mxu0 %v3046_v51  ;;  %2908 = vmatprep.mubr.msk.f32.mxu0 %vm818_vm5, %v1696_v61  ;;  %v2018_v51 = vld [vmem:[%s3363_s29 + $0x60] sm:$0xff]  ;;  %v1906_v61 = vrot.slane %v3406_v22, %v1905_v59 }
 0x97f   : > { %2911 = vmatprep.subr.mxu0 %v721_v32  ;;  %v3082_v53 = vpack.c.bf16 %v2019_v52, %v2018_v51  ;;  %v2137_v51 = vsub.s32 7, %v3402_v20 }
 0x981   : > { %2909 = vmatmul.mubr.msk.f32.vlgmr.msra.gmra.mrb[4].mxu0 %vm818_vm5, %v1697_v62 }
 0x982   : > { %2912 = vmatpush3.msra.mxu0 %v721_v32 }
 0x983   : > { %3059 = vmatprep.subr.bf16.mxu0 %v3058_v39 }
 0xa54   : > { %v2910_v63 = vpop.f32.mrb[4].mxu0 }
 0xa55   : > { %v1776_v0 = vpop.f32.mrb[5].mxu0 }
 0xa56   : > { %2913 = vmatprep.mubr.msk.f32.mxu0 %vm730_vm3, %v1776_v0 }
 0xa57   : > { %2914 = vmatmul.mubr.msk.f32.vlgmr.msra.gmra.mrb[0].mxu0 %vm730_vm3, %v2910_v63  ;;  %v1912_v63 = vrot.slane %v3406_v22, %v1911_v60 }
 0xa58   : > { %3061 = vmatpush3.bf16.msra.mxu0 %v3058_v39 }
 0xa59   : > { %3063 = vmatprep.subr.bf16.mxu0 %v3062_v41 }
 0xa5c   : > { %3065 = vmatpush3.bf16.msra.mxu0 %v3062_v41 }
 0xa5d   : > { %3067 = vmatprep.subr.bf16.mxu0 %v3066_v43 }
 0xa60   : > { %3069 = vmatpush3.bf16.msra.mxu0 %v3066_v43 }
 0xa61   : > { %3071 = vmatprep.subr.bf16.mxu0 %v3070_v45 }
 0xa64   : > { %3073 = vmatpush3.bf16.msra.mxu0 %v3070_v45 }
 0xa65   : > { %3075 = vmatprep.subr.bf16.mxu0 %v3074_v47 }
 0xa68   : > { %3077 = vmatpush3.bf16.msra.mxu0 %v3074_v47 }
 0xa69   : > { %3079 = vmatprep.subr.bf16.mxu0 %v3078_v50 }
 0xa6c   : > { %3081 = vmatpush3.bf16.msra.mxu0 %v3078_v50  ;;  %v2131_v50 = vsub.s32 6, %v3402_v20 }
 0xa6d   : > { %3083 = vmatprep.subr.bf16.mxu0 %v3082_v53 }
 0xa6e   : > { %v2132_v52 = vrot.slane %v3406_v22, %v2131_v50  ;;  %v2337_v50 = vand.u32 (!%p2709_p5), 127, %v632_v19 }
 0xa70   : > { %3085 = vmatpush3.bf16.msra.mxu0 %v3082_v53  ;;  %vm2338_vm6 = vcmp.eq.s32.totalorder (!%p2709_p5), %v2337_v50, 0 }
 0xb2a   : > { %v2915_v3 = vpop.f32.mrb[0].mxu0 }
 0xb2b   : > { %v1873_v4 = vadd.f32 %v2915_v3, %v1871_v2  ;;  %v1857_v5 = vpop.f32.mrb[1].mxu0 }
 0xb2c   : > { %v1872_v7 = vadd.f32 %v1871_v2, %v1857_v5 }
 0xb2d   : > { %v1875_v8 = vadd.f32 %v1873_v4, %v3397_v18 }
 0xb2e   : > { %v1874_v6 = vadd.f32 %v1872_v7, %v3393_v16 }
 0xb2f   : > { %v1879_v9 = vsel %vm636_vm2, %v1875_v8, 0.0 }
 0xb30   : > { %1880 = vadd.xlane.f32.xlu1 %v1879_v9  ;;  %v1876_v10 = vsel %vm636_vm2, %v1874_v6, 0.0 }
 0xb31   : > { %1877 = vadd.xlane.f32.xlu0 %v1876_v10  ;;  %v1921_v10 = vsub.s32 4, %v3402_v20 }
 0xbbd   : > { %v1881_v11 = vpop.xlane.xlu1 %1880 }
 0xbbe   : > { %v1884_v12 = vmul.f32 0.03125, %v1881_v11  ;;  %v1878_v13 = vpop.xlane.xlu0 %1877  ;;  %v1922_v11 = vrot.slane %v3406_v22, %v1921_v10 }
 0xbbf   : > { %v1883_v14 = vmul.f32 0.03125, %v1878_v13 }
 0xbc0   : > { %v3535_v15 = vsub.f32 %v1875_v8, %v1884_v12  ;;  %v2020_v8 = vld [vmem:[%s3363_s29 + $0x70] sm:$0xff] }
 0xbc1   : > { %v3537_v17 = vsub.f32 %v1874_v6, %v1883_v14  ;;  %v2021_v6 = vld [vmem:[%s3363_s29 + $0x78] sm:$0xff]  ;;  %s3254_s29 = smov (!%p2709_p5), 8  }
 0xbc2   : > { %v1888_v23 = vmul.f32 %v3535_v15, %v3535_v15  ;;  %v3086_v9 = vpack.c.bf16 %v2021_v6, %v2020_v8  ;;  %v2349_v8 = vld [vmem:[%s3704_s11] sm:$0xff] (!%p2709_p5)  ;;  %v2350_v6 = vld [vmem:[%s3704_s11 + $0x8] sm:$0xff] (!%p2709_p5) }
 0xbc3   : > { %v1887_v16 = vmul.f32 %v3537_v17, %v3537_v17 }
 0xbc4   : > { %v1892_v24 = vsel %vm636_vm2, %v1888_v23, 0.0  ;;  %3087 = vmatprep.subr.bf16.mxu0 %v3086_v9 }
 0xbc5   : > { %v1889_v18 = vsel %vm636_vm2, %v1887_v16, 0.0  ;;  %3089 = vmatpush3.bf16.msra.mxu0 %v3086_v9  ;;  %v3102_v9 = vpack.c.bf16 (!%p2709_p5), %v2350_v6, %v2349_v8 }
 0xbc6   : > { %1890 = vadd.xlane.f32.xlu0 %v1889_v18  ;;  %v2024_v18 = vsub.s32 5, %v3402_v20 }
 0xbc8   : > { %v2025_v23 = vrot.slane %v3406_v22, %v2024_v18 }
 0xbca   : > { %1893 = vadd.xlane.f32.xlu0 %v1892_v24 }
 0xc53   : > { %v1891_v54 = vpop.xlane.xlu0 %1890 }
 0xc54   : > { %v1895_v55 = vmul.f32 0.03125, %v1891_v54  ;;  %v2138_v54 = vrot.slane %v3406_v22, %v2137_v51  ;;  %v2149_v22 = vld [vmem:[%s3702_s9 + $0x8] sm:$0xff] (!%p2709_p5) }
 0xc56   : > { %v1897_v56 = vadd.f32 1e-05, %v1895_v55 }
 0xc57   : > { %v1894_v25 = vpop.xlane.xlu0 %1893 }
 0xc58   : > { %3215 = vrsqrt.f32 %v1897_v56  ;;  %v1896_v57 = vmul.f32 0.03125, %v1894_v25 }
 0xc5a   : > { %v1898_v58 = vadd.f32 1e-05, %v1896_v57 }
 0xc5c   : > { %3217 = vrsqrt.f32 %v1898_v58 }
 0xc62   : > { %v3216_v32 = vpop.eup %3215 }
 0xc63   : > { %v1901_v62 = vmul.f32 %v3216_v32, %v3537_v17 }
 0xc65   : > { %v1907_v0 = vmul.f32 %v1906_v61, %v1901_v62  ;;  %v2148_v62 = vld [vmem:[%s3702_s9] sm:$0xff] (!%p2709_p5) }
 0xc66   : > { %v3218_v2 = vpop.eup %3217 }
 0xc67   : > { %v1902_v3 = vmul.f32 %v3218_v2, %v3535_v15  ;;  %v1913_v4 = vadd.f32 %v1912_v63, %v1907_v0  ;;  %v3090_v0 = vpack.c.bf16 (!%p2709_p5), %v2149_v22, %v2148_v62  ;;  %v2151_v2 = vld [vmem:[%s3702_s9 + $0x18] sm:$0xff] (!%p2709_p5) }
 0xc69   : > { %v1908_v5 = vmul.f32 %v1906_v61, %v1902_v3  ;;  %2924 = vmatprep.mubr.msk.f32.mxu1 %vm636_vm2, %v1913_v4  ;;  %3091 = vmatprep.subr.bf16.mxu0 (!%p2709_p5), %v3090_v0 }
 0xc6b   : > { %v1914_v7 = vadd.f32 %v1912_v63, %v1908_v5  ;;  %v2150_v63 = vld [vmem:[%s3702_s9 + $0x10] sm:$0xff] (!%p2709_p5)  ;;  %v2238_v5 = vld [vmem:[%s3703_s10 + $0x8] sm:$0xff] (!%p2709_p5) }
 0xc6c   : > { %v3094_v3 = vpack.c.bf16 (!%p2709_p5), %v2151_v2, %v2150_v63  ;;  %v2471_v2 = vld [vmem:[%s3716_s21 + $0x8] sm:$0xff] (!%p2709_p5) }
 0xc6d   : > { %2925 = vmatmul.mubr.msk.f32.vlgmr.msra.gmra.mrb[14].mxu1 %vm636_vm2, %v1914_v7 }
 0xd40   : > { %v2926_v12 = vpop.f32.mrb[14].mxu1 }
 0xd41   : > { %v2001_v13 = vadd.f32 %v2926_v12, %v1922_v11  ;;  %v1995_v14 = vpop.f32.mrb[15].mxu1 }
 0xd42   : > { %v1996_v15 = vadd.f32 %v1995_v14, %v1922_v11  ;;  %v3625_v11 = vld [vmem:[%s3706_s13] sm:$0xff] (!%p2709_p5) }
 0xd43   : > { %v2005_v16 = vmax.f32 %v2001_v13, 0.0  ;;  %v2155_v12 = vrot.slane (!%p2709_p5), %v3625_v11, %v634_v21 }
 0xd44   : > { %v2004_v17 = vmax.f32 %v1996_v15, 0.0 }
 0xd46   : > { %2959 = vmatprep.mubr.f32.mxu0 %v2004_v17 }
 0xd47   : > { %2960 = vmatmul.mubr.f32.vlgmr.msra.gmra.mrb[6].mxu0 %v2005_v16 }
 0xd48   : > { %3093 = vmatpush3.bf16.msra.mxu0 (!%p2709_p5), %v3090_v0  ;;  %v2470_v0 = vld [vmem:[%s3716_s21] sm:$0xff] (!%p2709_p5) }
 0xd49   : > { %3095 = vmatprep.subr.bf16.mxu0 (!%p2709_p5), %v3094_v3 }
 0xd4c   : > { %3097 = vmatpush3.bf16.msra.mxu0 (!%p2709_p5), %v3094_v3  ;;  %v2472_v3 = vld [vmem:[%s3716_s21 + $0x10] sm:$0xff] (!%p2709_p5) }
 0xe1a   : > { %v2961_v24 = vpop.f32.mrb[6].mxu0 }
 0xe1b   : > { %v2092_v26 = vpop.f32.mrb[7].mxu0  ;;  %v2098_v28 = vadd.f32 %v2961_v24, %v2025_v23  ;;  %v2354_v24 = vrot.slane (!%p2709_p5), %v3625_v11, %v1905_v59 }
 0xe1c   : > { %v2093_v29 = vadd.f32 %v2092_v26, %v2025_v23 }
 0xe1d   : > { %v2102_v33 = vadd.f32 %v2098_v28, %v1914_v7 }
 0xe1e   : > { %v2101_v30 = vadd.f32 %v2093_v29, %v1913_v4  ;;  %v2237_v4 = vld [vmem:[%s3703_s10] sm:$0xff] (!%p2709_p5) }
 0xe1f   : > { %v2106_v34 = vsel %vm636_vm2, %v2102_v33, 0.0  ;;  %v3098_v7 = vpack.c.bf16 (!%p2709_p5), %v2238_v5, %v2237_v4  ;;  %v3106_v4 = vpack.c.bf16 (!%p2709_p5), %v2471_v2, %v2470_v0  ;;  %v2473_v5 = vld [vmem:[%s3716_s21 + $0x18] sm:$0xff] (!%p2709_p5) }
 0xe20   : > { %v2103_v31 = vsel %vm636_vm2, %v2101_v30, 0.0 }
 0xe21   : > { %2104 = vadd.xlane.f32.xlu0 %v2103_v31  ;;  %3099 = vmatprep.subr.bf16.mxu1 (!%p2709_p5), %v3098_v7 }
 0xe22   : > { %3101 = vmatpush3.bf16.msra.mxu1 (!%p2709_p5), %v3098_v7  ;;  %v3110_v7 = vpack.c.bf16 (!%p2709_p5), %v2473_v5, %v2472_v3  ;;  %3107 = vmatprep.subr.bf16.mxu0 (!%p2709_p5), %v3106_v4 }
 0xe23   : > { %3103 = vmatprep.subr.bf16.mxu1 (!%p2709_p5), %v3102_v9 }
 0xe25   : > { %2107 = vadd.xlane.f32.xlu0 %v2106_v34 }
 0xeae   : > { %v2105_v36 = vpop.xlane.xlu0 %2104 }
 0xeaf   : > { %v2109_v37 = vmul.f32 0.03125, %v2105_v36 }
 0xeb1   : > { %v2111_v39 = vsub.f32 %v2101_v30, %v2109_v37 }
 0xeb2   : > { %v2108_v40 = vpop.xlane.xlu0 %2107 }
 0xeb3   : > { %v2110_v41 = vmul.f32 0.03125, %v2108_v40  ;;  %v2113_v27 = vmul.f32 %v2111_v39, %v2111_v39 }
 0xeb5   : > { %v2112_v42 = vsub.f32 %v2102_v33, %v2110_v41  ;;  %v2115_v43 = vsel %vm636_vm2, %v2113_v27, 0.0  ;;  %v2242_v33 = vrot.slane (!%p2709_p5), %v3625_v11, %v1870_v1 }
 0xeb6   : > { %2116 = vadd.xlane.f32.xlu0 %v2115_v43 }
 0xeb7   : > { %v2114_v38 = vmul.f32 %v2112_v42, %v2112_v42 }
 0xeb9   : > { %v2118_v44 = vsel %vm636_vm2, %v2114_v38, 0.0 }
 0xeba   : > { %2119 = vadd.xlane.f32.xlu0 %v2118_v44 }
 0xf43   : > { %v2117_v45 = vpop.xlane.xlu0 %2116 }
 0xf44   : > { %v2121_v46 = vmul.f32 0.03125, %v2117_v45 }
 0xf46   : > { %v2123_v35 = vadd.f32 1e-05, %v2121_v46 }
 0xf47   : > { %v2120_v47 = vpop.xlane.xlu0 %2119 }
 0xf48   : > { %3219 = vrsqrt.f32 %v2123_v35  ;;  %v2122_v48 = vmul.f32 0.03125, %v2120_v47 }
 0xf4a   : > { %v2124_v49 = vadd.f32 1e-05, %v2122_v48 }
 0xf4c   : > { %3221 = vrsqrt.f32 %v2124_v49 }
 0xf52   : > { %v3220_v53 = vpop.eup %3219 }
 0xf53   : > { %v2127_v55 = vmul.f32 %v3220_v53, %v2111_v39  ;;  %v3255_v53 = vmov (!%p2709_p5), 0.8  }
 0xf55   : > { %v2133_v56 = vmul.f32 %v2132_v52, %v2127_v55 }
 0xf56   : > { %v3222_v25 = vpop.eup %3221 }
 0xf57   : > { %v2139_v57 = vadd.f32 %v2138_v54, %v2133_v56  ;;  %v2128_v58 = vmul.f32 %v3222_v25, %v2112_v42  ;;  %2146 = sbr.rel (%p2709_p5) target bundleno = 4907 (0x132b), region = 84 }
 0xf59   : > { %2141 = vst.msk [vmem:[#allocation2] sm:$0xff] %vm636_vm2, %v2139_v57  ;;  %v2134_v61 = vmul.f32 %v2132_v52, %v2128_v58  ;;  %2970 = vmatprep.mubr.msk.f32.mxu0 (!%p2709_p5), %vm636_vm2, %v2139_v57 }
 0xf5b   : > { %v2140_v32 = vadd.f32 %v2138_v54, %v2134_v61  ;;  %v2339_v54 = vsel (!%p2709_p5), %vm2338_vm6, 0.9, %v3255_v53 }
 0xf5d   : > { %2142 = vst.msk [vmem:[#allocation2 + $0x8] sm:$0xff] %vm636_vm2, %v2140_v32  ;;  %2971 = vmatmul.mubr.msk.f32.vlgmr.msra.gmra.mrb[0].mxu0 (!%p2709_p5), %vm636_vm2, %v2140_v32  ;;  %v3256_v32 = vmov (!%p2709_p5), 0.9  }
 0xf5e   : > { %v2340_v62 = vsel %vm2338_vm6, 1.0, %v3256_v32  ;;  %3109 = vmatpush3.bf16.msra.mxu0 %v3106_v4 }
 0xf5f   : > { %3111 = vmatprep.subr.bf16.mxu0 %v3110_v7 }
 0xf62   : > { %3113 = vmatpush3.bf16.msra.mxu0 %v3110_v7 }
0x1030   : > { %v2972_v13 = vpop.f32.mrb[0].mxu0 }
0x1031   : > { %v2228_v14 = vpop.f32.mrb[1].mxu0  ;;  %v2234_v17 = vadd.f32 %v2972_v13, %v2155_v12 }
0x1032   : > { %v2229_v15 = vadd.f32 %v2228_v14, %v2155_v12 }
0x1034   : > { %2977 = vmatprep.mubr.msk.f32.mxu1 %vm818_vm5, %v2229_v15 }
0x1035   : > { %2978 = vmatmul.mubr.msk.f32.vlgmr.msra.gmra.mrb[0].mxu1 %vm818_vm5, %v2234_v17 }
0x1036   : > { %3105 = vmatpush3.bf16.msra.mxu1 %v3102_v9  ;;  %2984 = vmatprep.mubr.msk.f32.mxu1 %vm818_vm5, %v2229_v15 }
0x1039   : > { %2985 = vmatmul.mubr.msk.f32.vlgmr.msra.gmra.mrb[2].mxu1 %vm818_vm5, %v2234_v17 }
0x1108   : > { %v2979_v16 = vpop.f32.mrb[0].mxu1 }
0x1109   : > { %v2315_v23 = vpop.f32.mrb[1].mxu1  ;;  %v2321_v36 = vadd.f32 %v2979_v16, %v2242_v33 }
0x110a   : > { %v2316_v34 = vadd.f32 %v2315_v23, %v2242_v33  ;;  %v2465_v23 = vrot.slane %v3625_v11, %v1921_v10 }
0x110b   : > { %v2325_v37 = vsub.f32 0.0, %v2321_v36 }
0x110c   : > { %v2986_v21 = vpop.f32.mrb[2].mxu1  ;;  %v2324_v59 = vsub.f32 0.0, %v2316_v34 }
0x110d   : > { %v2421_v26 = vpop.f32.mrb[3].mxu1  ;;  %v2427_v29 = vadd.f32 %v2986_v21, %v2354_v24  ;;  %v2328_v40 = vmul.f32 1.442695, %v2325_v37 }
0x110e   : > { %v2422_v28 = vadd.f32 %v2421_v26, %v2354_v24  ;;  %v2326_v39 = vmul.f32 1.442695, %v2324_v59 }
0x110f   : > { %v2433_v31 = vsel %vm636_vm2, %v2427_v29, 0.0 }
0x1110   : > { %v2430_v30 = vsel %vm636_vm2, %v2422_v28, 0.0  ;;  %3223 = vpow2.f32 %v2326_v39 }
0x1111   : > { %2431 = vadd.xlane.f32.xlu0 %v2430_v30  ;;  %3225 = vpow2.f32 %v2328_v40 }
0x1115   : > { %2434 = vadd.xlane.f32.xlu0 %v2433_v31 }
0x111a   : > { %v3224_v41 = vpop.eup %3223 }
0x111b   : > { %v2330_v43 = vadd.f32 1.0, %v3224_v41  ;;  %v3226_v38 = vpop.eup %3225 }
0x111c   : > { %v2331_v47 = vadd.f32 1.0, %v3226_v38 }
0x111d   : > { %3227 = vrcp.f32 %v2330_v43 }
0x111e   : > { %3229 = vrcp.f32 %v2331_v47 }
0x1127   : > { %v3228_v52 = vpop.eup %3227 }
0x1128   : > { %v2341_v55 = vmul.f32 %v3228_v52, %v2339_v54  ;;  %v3230_v56 = vpop.eup %3229 }
0x1129   : > { %v2342_v57 = vmul.f32 %v3230_v56, %v2339_v54 }
0x112a   : > { %v2343_v25 = vadd.f32 0.1, %v2341_v55 }
0x112b   : > { %2561 = vrot.lane.b32.xlu0 %v2229_v15, %s3254_s29  ;;  %v2344_v61 = vadd.f32 0.1, %v2342_v57  ;;  %v2459_v15 = vrot.slane %v3625_v11, %v1911_v60  ;;  %v2477_v60 = vrot.slane %v3625_v11, %v2024_v18 }
0x112c   : > { %v2345_v58 = vmax.f32 %v2343_v25, 0.1 }
0x112d   : > { %v2346_v19 = vmax.f32 %v2344_v61, 0.1 }
0x112e   : > { %v2347_v22 = vmin.f32 %v2340_v62, %v2345_v58 }
0x112f   : > { %v2348_v63 = vmin.f32 %v2340_v62, %v2346_v19 }
0x119e   : > { %v2432_v27 = vpop.xlane.xlu0 %2431 }
0x119f   : > { %v2436_v42 = vmul.f32 0.03125, %v2432_v27 }
0x11a1   : > { %v2438_v44 = vsub.f32 %v2422_v28, %v2436_v42 }
0x11a2   : > { %v2435_v45 = vpop.xlane.xlu0 %2434 }
0x11a3   : > { %v2437_v46 = vmul.f32 0.03125, %v2435_v45  ;;  %v2440_v35 = vmul.f32 %v2438_v44, %v2438_v44 }
0x11a5   : > { %v2439_v1 = vsub.f32 %v2427_v29, %v2437_v46  ;;  %v2442_v48 = vsel %vm636_vm2, %v2440_v35, 0.0 }
0x11a6   : > { %2443 = vadd.xlane.f32.xlu1 %v2442_v48  ;;  %v2562_v40 = vpop.permute.xlu0 %2561 }
0x11a7   : > { %v2441_v49 = vmul.f32 %v2439_v1, %v2439_v1 }
0x11a9   : > { %v2445_v51 = vsel %vm636_vm2, %v2441_v49, 0.0 }
0x11aa   : > { %2446 = vadd.xlane.f32.xlu1 %v2445_v51 }
0x11bb   : > { %2563 = vrot.lane.b32.xlu1 %v2234_v17, %s3254_s29 }
0x11bf   : > { %2572 = vrot.lane.b32.xlu1 %v2347_v22, %s3257_s23 }
0x11c3   : > { %2574 = vrot.lane.b32.xlu1 %v2348_v63, %s3257_s23 }
0x1233   : > { %v2444_v8 = vpop.xlane.xlu1 %2443 }
0x1234   : > { %v2448_v6 = vmul.f32 0.03125, %v2444_v8 }
0x1236   : > { %v2450_v9 = vadd.f32 1e-05, %v2448_v6 }
0x1237   : > { %v2447_v12 = vpop.xlane.xlu1 %2446 }
0x1238   : > { %3231 = vrsqrt.f32 %v2450_v9  ;;  %v2449_v13 = vmul.f32 0.03125, %v2447_v12 }
0x123a   : > { %v2451_v14 = vadd.f32 1e-05, %v2449_v13 }
0x123b   : > { %v2564_v34 = vpop.permute.xlu1 %2563 }
0x123c   : > { %3233 = vrsqrt.f32 %v2451_v14 }
0x123f   : > { %v2573_v36 = vpop.permute.xlu1 %2572 }
0x1242   : > { %v3232_v17 = vpop.eup %3231 }
0x1243   : > { %v2454_v16 = vmul.f32 %v3232_v17, %v2438_v44  ;;  %v2575_v41 = vpop.permute.xlu1 %2574 }
0x1245   : > { %v2460_v24 = vmul.f32 %v2459_v15, %v2454_v16 }
0x1246   : > { %v3234_v21 = vpop.eup %3233 }
0x1247   : > { %v2466_v26 = vadd.f32 %v2465_v23, %v2460_v24  ;;  %v2455_v28 = vmul.f32 %v3234_v21, %v2439_v1 }
0x1249   : > { %v2468_v29 = vmax.f32 %v2466_v26, 0.0  ;;  %v2461_v30 = vmul.f32 %v2459_v15, %v2455_v28 }
0x124b   : > { %2995 = vmatprep.mubr.msk.f32.mxu0 %vm636_vm2, %v2468_v29  ;;  %v2467_v31 = vadd.f32 %v2465_v23, %v2461_v30 }
0x124d   : > { %v2469_v33 = vmax.f32 %v2467_v31, 0.0 }
0x124f   : > { %2996 = vmatmul.mubr.msk.f32.vlgmr.msra.gmra.mrb[2].mxu0 %vm636_vm2, %v2469_v33 }
0x1322   : > { %v2997_v59 = vpop.f32.mrb[2].mxu0 }
0x1323   : > { %v2556_v10 = vadd.f32 %v2997_v59, %v2477_v60  ;;  %v2550_v37 = vpop.f32.mrb[3].mxu0 }
0x1324   : > { %v2551_v39 = vadd.f32 %v2550_v37, %v2477_v60 }
0x1325   : > { %2560 = vst.msk [vmem:[%s3717_s15 + $0x8] sm:$0xff] %vm730_vm3, %v2556_v10 }
0x1326   : > { %2569 = vst.msk [vmem:[%s3717_s15 + $0x8] sm:$0xff] %vm2567_vm7, %v2564_v34 }
0x1327   : > { %2559 = vst.msk [vmem:[%s3717_s15] sm:$0xff] %vm730_vm3, %v2551_v39 }
0x1328   : > { %2580 = vst.msk [vmem:[%s3717_s15 + $0x8] sm:$0xff] %vm2578_vm8, %v2575_v41 }
0x1329   : > { %2568 = vst.msk [vmem:[%s3717_s15] sm:$0xff] %vm2567_vm7, %v2562_v40 }
0x132a   : > { %2579 = vst.msk [vmem:[%s3717_s15] sm:$0xff] %vm2578_vm8, %v2573_v36 }
0x132b PF: > { %s3718_s24 = sld [smem:[#allocation3_spill]] }
0x1331   : > { %s24_s29 = sadd.s32 1, %s3718_s24  }
0x1332   : > { %p21_p6 = scmp.ge.s32.totalorder %s24_s29, 5  }
0x1334   :  { %23 = sbr.rel (!%p21_p6) target bundleno = 3 (0x3), region = 122 }

</bundles_post_ra>
